<compile_context>
chip_gen: v7x
topology: tpu7x:2x2x1
jax: 0.10.0
libtpu: 0.0.40
codegen_flags: <defaults>
</compile_context>

<pallas_src>
import functools
import math

import jax
import jax.numpy as jnp
from jax.experimental import pallas as pl
from jax.experimental.pallas import tpu as pltpu


# ----------------------------- config ---------------------------------------
class GPTConfig:
    block_size = 16     # small synthetic shapes
    vocab_size = 64
    n_layer = 2
    n_head = 4
    n_embd = 32


LN_EPS = 1e-5


# ----------------------------- kernel helpers --------------------------------
def _layernorm(x, gamma, beta):
    # x: (T, C); gamma/beta: (1, C)
    mu = jnp.mean(x, axis=-1, keepdims=True)
    xc = x - mu
    var = jnp.mean(xc * xc, axis=-1, keepdims=True)
    return xc * jax.lax.rsqrt(var + LN_EPS) * gamma + beta


def _gelu_tanh(x):
    # GELU(approximate='tanh'), matching torch.nn.GELU(approximate='tanh')
    c = math.sqrt(2.0 / math.pi)
    return 0.5 * x * (1.0 + jnp.tanh(c * (x + 0.044715 * x * x * x)))


# ----------------------------- Pallas kernel ---------------------------------
# Per-layer slab layout (rows x 4C lanes), all f32:
#   rows [0      , C)      : w_attn = [ w_qkv (C,3C) | w_ao (C,C) ]
#   rows [C      , 2C)     : w_fc   (C, 4C)
#   rows [2C     , 3C)     : w_pr^T (C, 4C)
#   rows [3C     , 3C+8)   : vec    (8, 4C):
#       row 0: ln1_g | row 1: ln1_b | row 2: ln2_g | row 3: ln2_b
#       row 4: b_ao  | row 5: b_pr  | row 6: b_fc (4C) | row 7: b_qkv (3C, padded)
#   rows [3C+8   , 3C+8+Tp): additive causal mask (T,T) in the top-left corner
def gpt_stack_kernel(x_ref, w_ref, o_ref, *, n_head, layer_axis):
    Bb, T, C = o_ref.shape
    H = n_head
    hd = C // H
    scale = 1.0 / math.sqrt(hd)
    vrow = 3 * C
    mrow = vrow + 8

    # Layer 0: load the embeddings into the resident activation buffer.
    @pl.when(pl.program_id(layer_axis) == 0)
    def _():
        o_ref[...] = x_ref[...]

    # ---- per-layer parameters (one consolidated slab) ------------------------
    w_attn = w_ref[0:C, :]                 # (C, 4C)  [w_qkv | w_ao]
    w_fc = w_ref[C:2 * C, :]               # (C, 4C)
    w_prT = w_ref[2 * C:3 * C, :]          # (C, 4C)  (= w_pr transposed)
    vec = w_ref[vrow:vrow + 8, :]          # (8, 4C)
    mask = w_ref[mrow:mrow + T, 0:T]       # (T, T)   additive causal mask

    ln1_g, ln1_b = vec[0:1, :C], vec[1:2, :C]
    ln2_g, ln2_b = vec[2:3, :C], vec[3:4, :C]
    b_ao, b_pr = vec[4:5, :C], vec[5:6, :C]
    b_fc = vec[6:7, :]                     # (1, 4C)
    b_qkv = vec[7:8, :]                    # (1, 4C)  (zeros past 3C)
    w_ao = w_attn[:, 3 * C:]               # (C, C)

    # Static per-batch-row loop (Bb == 1 when batch is a grid axis).
    for b in range(Bb):
        x = o_ref[b]                       # (T, C), resident in VMEM across layers

        # ---- ln_1 + causal self-attention -----------------------------------
        xn = _layernorm(x, ln1_g, ln1_b)
        # One lane-dense matmul: lanes [0,3C) = qkv, lanes [3C,4C) unused.
        qkvo = jnp.dot(xn, w_attn, preferred_element_type=jnp.float32) + b_qkv

        qh = jnp.stack([qkvo[:, h * hd:(h + 1) * hd] for h in range(H)], axis=0)
        kh = jnp.stack([qkvo[:, C + h * hd:C + (h + 1) * hd] for h in range(H)], axis=0)
        vh = jnp.stack([qkvo[:, 2 * C + h * hd:2 * C + (h + 1) * hd] for h in range(H)], axis=0)

        att = jnp.einsum("hqd,hkd->hqk", qh, kh,
                         preferred_element_type=jnp.float32) * scale
        att = att + mask[None, :, :]                      # hoisted additive mask
        att = att - jnp.max(att, axis=-1, keepdims=True)
        p = jnp.exp(att)
        p = p / jnp.sum(p, axis=-1, keepdims=True)        # exact softmax (f32 parity)

        y = jnp.einsum("hqk,hkd->hqd", p, vh, preferred_element_type=jnp.float32)
        y_cat = jnp.concatenate([y[h] for h in range(H)], axis=-1)   # (T, C)
        attn_out = jnp.dot(y_cat, w_ao, preferred_element_type=jnp.float32) + b_ao

        x = x + attn_out                   # residual 1

        # ---- ln_2 + MLP -------------------------------------------------------
        xn2 = _layernorm(x, ln2_g, ln2_b)
        hmid = jnp.dot(xn2, w_fc, preferred_element_type=jnp.float32) + b_fc
        hmid = _gelu_tanh(hmid)
        mlp = jnp.einsum("tk,ck->tc", hmid, w_prT,
                         preferred_element_type=jnp.float32) + b_pr

        o_ref[b] = x + mlp                 # residual 2; resident until last layer


# ----------------------------- wrapper ---------------------------------------
def pack_params(params, cfg, T):
    """Pack each layer's weights/biases/LN/mask into one (rows, 4C) f32 slab."""
    C = cfg.n_embd
    W = 4 * C
    mask_rows = ((T + 7) // 8) * 8

    row_i = jnp.arange(T)[:, None]
    col_i = jnp.arange(T)[None, :]
    addmask = jnp.where(col_i <= row_i, 0.0, -1e30).astype(jnp.float32)   # (T, T)
    mask_blk = jnp.zeros((mask_rows, W), jnp.float32).at[:T, :T].set(addmask)

    slabs = []
    for p in params["blocks"]:
        w_attn = jnp.concatenate([p["w_qkv"], p["w_ao"]], axis=1)         # (C, 4C)
        vec = jnp.zeros((8, W), jnp.float32)
        vec = vec.at[0, :C].set(p["ln1_g"][0])
        vec = vec.at[1, :C].set(p["ln1_b"][0])
        vec = vec.at[2, :C].set(p["ln2_g"][0])
        vec = vec.at[3, :C].set(p["ln2_b"][0])
        vec = vec.at[4, :C].set(p["b_ao"][0])
        vec = vec.at[5, :C].set(p["b_pr"][0])
        vec = vec.at[6, :].set(p["b_fc"][0])
        vec = vec.at[7, :3 * C].set(p["b_qkv"][0])
        slab = jnp.concatenate(
            [w_attn, p["w_fc"], p["w_pr"].T, vec, mask_blk], axis=0)       # (R, 4C)
        slabs.append(slab)
    return jnp.stack(slabs, axis=0)                                        # (L, R, 4C)


def _has_multiple_tensorcores():
    """True on parts where a 'parallel' grid axis splits across TensorCores."""
    try:
        kind = jax.devices()[0].device_kind.lower()
    except Exception:
        return False
    return any(tag in kind for tag in ("v7", "v4", "v5p"))


def gpt_stack(x, slab, cfg):
    """All transformer blocks in one pallas_call; activations stay in VMEM."""
    B, T, C = x.shape
    L, R, W = slab.shape
    assert C == cfg.n_embd and cfg.n_embd % cfg.n_head == 0

    if _has_multiple_tensorcores() and B >= 2:
        # v7x (and other multi-TC parts): batch splits across TensorCores.
        grid = (B, L)
        in_specs = [pl.BlockSpec((1, T, C), lambda b, l: (b, 0, 0)),
                    pl.BlockSpec((None, R, W), lambda b, l: (l, 0, 0))]
        out_spec = pl.BlockSpec((1, T, C), lambda b, l: (b, 0, 0))
        dims = ("parallel", "arbitrary")
        layer_axis = 1
    else:
        # v5e/v6e (single TC): fold batch into the block -> half the grid steps
        # and half the weight DMA traffic.
        grid = (L,)
        in_specs = [pl.BlockSpec((B, T, C), lambda l: (0, 0, 0)),
                    pl.BlockSpec((None, R, W), lambda l: (l, 0, 0))]
        out_spec = pl.BlockSpec((B, T, C), lambda l: (0, 0, 0))
        dims = ("arbitrary",)
        layer_axis = 0

    return pl.pallas_call(
        functools.partial(gpt_stack_kernel, n_head=cfg.n_head, layer_axis=layer_axis),
        out_shape=jax.ShapeDtypeStruct((B, T, C), jnp.float32),
        grid=grid,
        in_specs=in_specs,
        out_specs=out_spec,
        compiler_params=pltpu.CompilerParams(dimension_semantics=dims),
    )(x, slab)


# ----------------------------- parameter init --------------------------------
def init_params(cfg, key):
    C = cfg.n_embd
    std = 0.02

    def nrm(k, shape):
        return jax.random.normal(k, shape, jnp.float32) * std

    keys = jax.random.split(key, 2 + cfg.n_layer)
    params = {
        "wte": nrm(keys[0], (cfg.vocab_size, C)),
        "wpe": nrm(keys[1], (cfg.block_size, C)),
        "blocks": [],
    }
    for l in range(cfg.n_layer):
        k = jax.random.split(keys[2 + l], 6)
        blk = {
            "ln1_g": jnp.ones((1, C), jnp.float32),
            "ln1_b": jnp.zeros((1, C), jnp.float32),
            "w_qkv": nrm(k[0], (C, 3 * C)),
            "b_qkv": nrm(k[1], (1, 3 * C)),
            "w_ao": nrm(k[2], (C, C)),
            "b_ao": nrm(k[3], (1, C)),
            "ln2_g": jnp.ones((1, C), jnp.float32),
            "ln2_b": jnp.zeros((1, C), jnp.float32),
            "w_fc": nrm(k[4], (C, 4 * C)),
            "b_fc": jnp.zeros((1, 4 * C), jnp.float32),
            "w_pr": nrm(k[5], (4 * C, C)),
            "b_pr": jnp.zeros((1, C), jnp.float32),
        }
        params["blocks"].append(blk)
    return params


# ----------------------------- GPT forward ------------------------------------
def gpt_forward(idx, params, cfg, till_layer):
    B, T = idx.shape
    assert T <= cfg.block_size, "Cannot forward, model block size is exhausted."

    # glue: embedding gathers in plain JAX
    tok_emb = jnp.take(params["wte"], idx, axis=0)            # (B, T, C)
    pos_emb = params["wpe"][:T]                                # (T, C)
    x = (tok_emb + pos_emb[None, :, :]).astype(jnp.float32)

    # TODO(synk): dump_partial_state (file write after `till_layer` blocks) is
    # skipped; all blocks run fused in one pallas_call, so `till_layer` has no
    # effect on the returned value (matching the reference return value).
    del till_layer
    slab = pack_params(params, cfg, T)
    return gpt_stack(x, slab, cfg)


# ----------------------------- reference (pure JAX) ---------------------------
def _ref_block(x, p, n_head):
    B, T, C = x.shape
    hd = C // n_head

    def ln(v, g, b):
        mu = v.mean(-1, keepdims=True)
        var = ((v - mu) ** 2).mean(-1, keepdims=True)
        return (v - mu) / jnp.sqrt(var + LN_EPS) * g + b

    xn = ln(x, p["ln1_g"][0], p["ln1_b"][0])
    qkv = xn @ p["w_qkv"] + p["b_qkv"][0]
    q, k, v = jnp.split(qkv, 3, axis=-1)
    q = q.reshape(B, T, n_head, hd).transpose(0, 2, 1, 3)
    k = k.reshape(B, T, n_head, hd).transpose(0, 2, 1, 3)
    v = v.reshape(B, T, n_head, hd).transpose(0, 2, 1, 3)
    att = (q @ k.transpose(0, 1, 3, 2)) / math.sqrt(hd)
    mask = jnp.tril(jnp.ones((T, T), bool))
    att = jnp.where(mask, att, -jnp.inf)
    att = jax.nn.softmax(att, axis=-1)
    y = (att @ v).transpose(0, 2, 1, 3).reshape(B, T, C)
    x = x + (y @ p["w_ao"] + p["b_ao"][0])

    xn2 = ln(x, p["ln2_g"][0], p["ln2_b"][0])
    h = xn2 @ p["w_fc"] + p["b_fc"][0]
    h = 0.5 * h * (1 + jnp.tanh(math.sqrt(2 / math.pi) * (h + 0.044715 * h ** 3)))
    return x + (h @ p["w_pr"] + p["b_pr"][0])


def _ref_forward(idx, params, cfg):
    T = idx.shape[1]
    x = jnp.take(params["wte"], idx, axis=0) + params["wpe"][:T][None]
    for blk in params["blocks"]:
        x = _ref_block(x, blk, cfg.n_head)
    return x


# ----------------------------- main -------------------------------------------
if __name__ == "__main__":
    cfg = GPTConfig()
    key = jax.random.PRNGKey(0)
    pkey, ikey = jax.random.split(key)

    params = init_params(cfg, pkey)

    B, T = 2, 8
    idx = jax.random.randint(ikey, (B, T), 0, cfg.vocab_size, dtype=jnp.int32)

    out = gpt_forward(idx, params, cfg, till_layer=1)
    out = jax.block_until_ready(out)

    ref = _ref_forward(idx, params, cfg)
    assert out.shape == (B, T, cfg.n_embd)
    # Exact softmax + f32 MXU everywhere -> tight f32 parity with the reference.
    assert jnp.allclose(out, ref, atol=1e-5, rtol=1e-5), "mismatch vs JAX reference"

    print("KERNEL_OK")
</pallas_src>

<mosaic_0001>
module attributes {stable_mosaic.version = 11 : i64} {
  func.func @gpt_stack_kernel(%arg0: i32, %arg1: memref<2x8x32xf32, #tpu.memory_space<vmem>>, %arg2: memref<1x112x128xf32, #tpu.memory_space<vmem>>, %arg3: memref<2x8x32xf32, #tpu.memory_space<vmem>>) attributes {dimension_semantics = [#tpu.dimension_semantics<arbitrary>], iteration_bounds = array<i64: 2>, scalar_prefetch = 0 : i64, scratch_operands = 0 : i64, tpu.core_type = #tpu.core_type<tc>, window_params = [{pipeline_mode = #tpu.pipeline_mode<synchronous>, transform_indices = @transform_0, window_bounds = array<i64: 2, 8, 32>}, {transform_indices = @transform_1, window_bounds = array<i64: 1, 112, 128>}, {pipeline_mode = #tpu.pipeline_mode<synchronous>, transform_indices = @transform_2, window_bounds = array<i64: 2, 8, 32>}]} {
    %c0_i32 = arith.constant 0 : i32
    %0 = arith.cmpi eq, %arg0, %c0_i32 : i32
    %1 = arith.extui %0 : i1 to i32
    %c0_i32_0 = arith.constant 0 : i32
    %2 = arith.cmpi ne, %1, %c0_i32_0 : i32
    scf.if %2 {
      %c0_67 = arith.constant 0 : index
      %c0_68 = arith.constant 0 : index
      %c0_69 = arith.constant 0 : index
      %270 = vector.load %arg1[%c0_67, %c0_68, %c0_69] : memref<2x8x32xf32, #tpu.memory_space<vmem>>, vector<2x8x32xf32>
      %c0_70 = arith.constant 0 : index
      %c0_71 = arith.constant 0 : index
      %c0_72 = arith.constant 0 : index
      %271 = vector.load %arg3[%c0_70, %c0_71, %c0_72] : memref<2x8x32xf32, #tpu.memory_space<vmem>>, vector<2x8x32xf32>
      tpu.vector_store %arg3[%c0_70, %c0_71, %c0_72], %270 {strides = array<i32>} : memref<2x8x32xf32, #tpu.memory_space<vmem>>, vector<2x8x32xf32>,
    } else {
    }
    %c0 = arith.constant 0 : index
    %c0_1 = arith.constant 0 : index
    %c0_2 = arith.constant 0 : index
    %3 = vector.load %arg2[%c0, %c0_1, %c0_2] : memref<1x112x128xf32, #tpu.memory_space<vmem>>, vector<1x32x128xf32>
    %4 = vector.shape_cast %3 : vector<1x32x128xf32> to vector<32x128xf32>
    %c0_3 = arith.constant 0 : index
    %c32 = arith.constant 32 : index
    %c0_4 = arith.constant 0 : index
    %5 = vector.load %arg2[%c0_3, %c32, %c0_4] : memref<1x112x128xf32, #tpu.memory_space<vmem>>, vector<1x32x128xf32>
    %6 = vector.shape_cast %5 : vector<1x32x128xf32> to vector<32x128xf32>
    %c0_5 = arith.constant 0 : index
    %c64 = arith.constant 64 : index
    %c0_6 = arith.constant 0 : index
    %7 = vector.load %arg2[%c0_5, %c64, %c0_6] : memref<1x112x128xf32, #tpu.memory_space<vmem>>, vector<1x32x128xf32>
    %8 = vector.shape_cast %7 : vector<1x32x128xf32> to vector<32x128xf32>
    %c0_7 = arith.constant 0 : index
    %c96 = arith.constant 96 : index
    %c0_8 = arith.constant 0 : index
    %9 = vector.load %arg2[%c0_7, %c96, %c0_8] : memref<1x112x128xf32, #tpu.memory_space<vmem>>, vector<1x8x128xf32>
    %10 = vector.shape_cast %9 : vector<1x8x128xf32> to vector<8x128xf32>
    %c0_9 = arith.constant 0 : index
    %c104 = arith.constant 104 : index
    %c0_10 = arith.constant 0 : index
    %11 = vector.load %arg2[%c0_9, %c104, %c0_10] : memref<1x112x128xf32, #tpu.memory_space<vmem>>, vector<1x8x8xf32>
    %12 = vector.shape_cast %11 : vector<1x8x8xf32> to vector<8x8xf32>
    %13 = vector.extract_strided_slice %10 {offsets = [0, 0], sizes = [1, 32], strides = [1, 1]} : vector<8x128xf32> to vector<1x32xf32>
    %14 = vector.extract_strided_slice %10 {offsets = [1, 0], sizes = [1, 32], strides = [1, 1]} : vector<8x128xf32> to vector<1x32xf32>
    %15 = vector.extract_strided_slice %10 {offsets = [2, 0], sizes = [1, 32], strides = [1, 1]} : vector<8x128xf32> to vector<1x32xf32>
    %16 = vector.extract_strided_slice %10 {offsets = [3, 0], sizes = [1, 32], strides = [1, 1]} : vector<8x128xf32> to vector<1x32xf32>
    %17 = vector.extract_strided_slice %10 {offsets = [4, 0], sizes = [1, 32], strides = [1, 1]} : vector<8x128xf32> to vector<1x32xf32>
    %18 = vector.extract_strided_slice %10 {offsets = [5, 0], sizes = [1, 32], strides = [1, 1]} : vector<8x128xf32> to vector<1x32xf32>
    %19 = vector.extract_strided_slice %10 {offsets = [6, 0], sizes = [1, 128], strides = [1, 1]} : vector<8x128xf32> to vector<1x128xf32>
    %20 = vector.extract_strided_slice %10 {offsets = [7, 0], sizes = [1, 128], strides = [1, 1]} : vector<8x128xf32> to vector<1x128xf32>
    %21 = vector.extract_strided_slice %4 {offsets = [0, 96], sizes = [32, 32], strides = [1, 1]} : vector<32x128xf32> to vector<32x32xf32>
    %c0_11 = arith.constant 0 : index
    %c0_12 = arith.constant 0 : index
    %c0_13 = arith.constant 0 : index
    %22 = vector.load %arg3[%c0_11, %c0_12, %c0_13] : memref<2x8x32xf32, #tpu.memory_space<vmem>>, vector<1x8x32xf32>
    %23 = vector.shape_cast %22 : vector<1x8x32xf32> to vector<8x32xf32>
    %cst = arith.constant dense<0.000000e+00> : vector<8xf32>
    %24 = vector.multi_reduction <add>, %23, %cst [1] : vector<8x32xf32> to vector<8xf32>
    %25 = vector.shape_cast %24 : vector<8xf32> to vector<8x1xf32>
    %cst_14 = arith.constant 3.200000e+01 : f32
    %26 = vector.broadcast %cst_14 : f32 to vector<8x1xf32>
    %27 = arith.divf %25, %26 : vector<8x1xf32>
    %28 = vector.broadcast %27 : vector<8x1xf32> to vector<8x32xf32>
    %29 = arith.subf %23, %28 : vector<8x32xf32>
    %30 = arith.mulf %29, %29 : vector<8x32xf32>
    %cst_15 = arith.constant dense<0.000000e+00> : vector<8xf32>
    %31 = vector.multi_reduction <add>, %30, %cst_15 [1] : vector<8x32xf32> to vector<8xf32>
    %32 = vector.shape_cast %31 : vector<8xf32> to vector<8x1xf32>
    %cst_16 = arith.constant 3.200000e+01 : f32
    %33 = vector.broadcast %cst_16 : f32 to vector<8x1xf32>
    %34 = arith.divf %32, %33 : vector<8x1xf32>
    %cst_17 = arith.constant 9.99999974E-6 : f32
    %35 = vector.broadcast %cst_17 : f32 to vector<8x1xf32>
    %36 = arith.addf %34, %35 : vector<8x1xf32>
    %37 = math.rsqrt %36 : vector<8x1xf32>
    %38 = vector.broadcast %37 : vector<8x1xf32> to vector<8x32xf32>
    %39 = arith.mulf %29, %38 : vector<8x32xf32>
    %40 = vector.broadcast %13 : vector<1x32xf32> to vector<8x32xf32>
    %41 = arith.mulf %39, %40 : vector<8x32xf32>
    %42 = vector.broadcast %14 : vector<1x32xf32> to vector<8x32xf32>
    %43 = arith.addf %41, %42 : vector<8x32xf32>
    %cst_18 = arith.constant dense<0.000000e+00> : vector<8x128xf32>
    %44 = tpu.matmul %43, %4, %cst_18 {dimension_numbers = #tpu.dot_dimension_numbers<[1], [0], [0], [1], [0, 0, 1, 1], [], []>} : vector<8x32xf32>, vector<32x128xf32>, vector<8x128xf32> -> vector<8x128xf32>
    %45 = vector.broadcast %20 : vector<1x128xf32> to vector<8x128xf32>
    %46 = arith.addf %44, %45 : vector<8x128xf32>
    %47 = vector.extract_strided_slice %46 {offsets = [0, 0], sizes = [8, 8], strides = [1, 1]} : vector<8x128xf32> to vector<8x8xf32>
    %48 = vector.extract_strided_slice %46 {offsets = [0, 8], sizes = [8, 8], strides = [1, 1]} : vector<8x128xf32> to vector<8x8xf32>
    %49 = vector.extract_strided_slice %46 {offsets = [0, 16], sizes = [8, 8], strides = [1, 1]} : vector<8x128xf32> to vector<8x8xf32>
    %50 = vector.extract_strided_slice %46 {offsets = [0, 24], sizes = [8, 8], strides = [1, 1]} : vector<8x128xf32> to vector<8x8xf32>
    %51 = vector.shape_cast %47 : vector<8x8xf32> to vector<1x8x8xf32>
    %52 = vector.shape_cast %48 : vector<8x8xf32> to vector<1x8x8xf32>
    %53 = vector.shape_cast %49 : vector<8x8xf32> to vector<1x8x8xf32>
    %54 = vector.shape_cast %50 : vector<8x8xf32> to vector<1x8x8xf32>
    %55 = tpu.concatenate %51, %52, %53, %54 in 0 : vector<1x8x8xf32>, vector<1x8x8xf32>, vector<1x8x8xf32>, vector<1x8x8xf32> -> vector<4x8x8xf32>
    %56 = vector.extract_strided_slice %46 {offsets = [0, 32], sizes = [8, 8], strides = [1, 1]} : vector<8x128xf32> to vector<8x8xf32>
    %57 = vector.extract_strided_slice %46 {offsets = [0, 40], sizes = [8, 8], strides = [1, 1]} : vector<8x128xf32> to vector<8x8xf32>
    %58 = vector.extract_strided_slice %46 {offsets = [0, 48], sizes = [8, 8], strides = [1, 1]} : vector<8x128xf32> to vector<8x8xf32>
    %59 = vector.extract_strided_slice %46 {offsets = [0, 56], sizes = [8, 8], strides = [1, 1]} : vector<8x128xf32> to vector<8x8xf32>
    %60 = vector.shape_cast %56 : vector<8x8xf32> to vector<1x8x8xf32>
    %61 = vector.shape_cast %57 : vector<8x8xf32> to vector<1x8x8xf32>
    %62 = vector.shape_cast %58 : vector<8x8xf32> to vector<1x8x8xf32>
    %63 = vector.shape_cast %59 : vector<8x8xf32> to vector<1x8x8xf32>
    %64 = tpu.concatenate %60, %61, %62, %63 in 0 : vector<1x8x8xf32>, vector<1x8x8xf32>, vector<1x8x8xf32>, vector<1x8x8xf32> -> vector<4x8x8xf32>
    %65 = vector.extract_strided_slice %46 {offsets = [0, 64], sizes = [8, 8], strides = [1, 1]} : vector<8x128xf32> to vector<8x8xf32>
    %66 = vector.extract_strided_slice %46 {offsets = [0, 72], sizes = [8, 8], strides = [1, 1]} : vector<8x128xf32> to vector<8x8xf32>
    %67 = vector.extract_strided_slice %46 {offsets = [0, 80], sizes = [8, 8], strides = [1, 1]} : vector<8x128xf32> to vector<8x8xf32>
    %68 = vector.extract_strided_slice %46 {offsets = [0, 88], sizes = [8, 8], strides = [1, 1]} : vector<8x128xf32> to vector<8x8xf32>
    %69 = vector.shape_cast %65 : vector<8x8xf32> to vector<1x8x8xf32>
    %70 = vector.shape_cast %66 : vector<8x8xf32> to vector<1x8x8xf32>
    %71 = vector.shape_cast %67 : vector<8x8xf32> to vector<1x8x8xf32>
    %72 = vector.shape_cast %68 : vector<8x8xf32> to vector<1x8x8xf32>
    %73 = tpu.concatenate %69, %70, %71, %72 in 0 : vector<1x8x8xf32>, vector<1x8x8xf32>, vector<1x8x8xf32>, vector<1x8x8xf32> -> vector<4x8x8xf32>
    "tpu.trace_start"() <{level = 10 : i32, message = "hqd,hkd->hqk"}> : () -> ()
    %cst_19 = arith.constant dense<0.000000e+00> : vector<4x8x8xf32>
    %74 = tpu.matmul %55, %64, %cst_19 {dimension_numbers = #tpu.dot_dimension_numbers<[2], [2], [1], [1], [0, 0, 0, 1, 1, 1], [0], [0]>} : vector<4x8x8xf32>, vector<4x8x8xf32>, vector<4x8x8xf32> -> vector<4x8x8xf32>
    "tpu.trace_stop"() : () -> ()
    %cst_20 = arith.constant 0.353553385 : f32
    %75 = vector.broadcast %cst_20 : f32 to vector<4x8x8xf32>
    %76 = arith.mulf %74, %75 : vector<4x8x8xf32>
    %77 = vector.shape_cast %12 : vector<8x8xf32> to vector<1x8x8xf32>
    %78 = vector.broadcast %77 : vector<1x8x8xf32> to vector<4x8x8xf32>
    %79 = arith.addf %76, %78 : vector<4x8x8xf32>
    %cst_21 = arith.constant dense<0xFF800000> : vector<4x8xf32>
    %80 = vector.multi_reduction <maximumf>, %79, %cst_21 [2] : vector<4x8x8xf32> to vector<4x8xf32>
    %81 = vector.shape_cast %80 : vector<4x8xf32> to vector<4x8x1xf32>
    %82 = vector.broadcast %81 : vector<4x8x1xf32> to vector<4x8x8xf32>
    %83 = arith.subf %79, %82 : vector<4x8x8xf32>
    %84 = math.exp %83 : vector<4x8x8xf32>
    %cst_22 = arith.constant dense<0.000000e+00> : vector<4x8xf32>
    %85 = vector.multi_reduction <add>, %84, %cst_22 [2] : vector<4x8x8xf32> to vector<4x8xf32>
    %86 = vector.shape_cast %85 : vector<4x8xf32> to vector<4x8x1xf32>
    %87 = vector.broadcast %86 : vector<4x8x1xf32> to vector<4x8x8xf32>
    %88 = arith.divf %84, %87 : vector<4x8x8xf32>
    "tpu.trace_start"() <{level = 10 : i32, message = "hqk,hkd->hqd"}> : () -> ()
    %cst_23 = arith.constant dense<0.000000e+00> : vector<4x8x8xf32>
    %89 = tpu.matmul %88, %73, %cst_23 {dimension_numbers = #tpu.dot_dimension_numbers<[2], [1], [1], [2], [0, 0, 0, 1, 1, 2], [0], [0]>} : vector<4x8x8xf32>, vector<4x8x8xf32>, vector<4x8x8xf32> -> vector<4x8x8xf32>
    "tpu.trace_stop"() : () -> ()
    %90 = vector.extract_strided_slice %89 {offsets = [0, 0, 0], sizes = [1, 8, 8], strides = [1, 1, 1]} : vector<4x8x8xf32> to vector<1x8x8xf32>
    %91 = vector.shape_cast %90 : vector<1x8x8xf32> to vector<8x8xf32>
    %92 = vector.extract_strided_slice %89 {offsets = [1, 0, 0], sizes = [1, 8, 8], strides = [1, 1, 1]} : vector<4x8x8xf32> to vector<1x8x8xf32>
    %93 = vector.shape_cast %92 : vector<1x8x8xf32> to vector<8x8xf32>
    %94 = vector.extract_strided_slice %89 {offsets = [2, 0, 0], sizes = [1, 8, 8], strides = [1, 1, 1]} : vector<4x8x8xf32> to vector<1x8x8xf32>
    %95 = vector.shape_cast %94 : vector<1x8x8xf32> to vector<8x8xf32>
    %96 = vector.extract_strided_slice %89 {offsets = [3, 0, 0], sizes = [1, 8, 8], strides = [1, 1, 1]} : vector<4x8x8xf32> to vector<1x8x8xf32>
    %97 = vector.shape_cast %96 : vector<1x8x8xf32> to vector<8x8xf32>
    %98 = tpu.concatenate %91, %93, %95, %97 in 1 : vector<8x8xf32>, vector<8x8xf32>, vector<8x8xf32>, vector<8x8xf32> -> vector<8x32xf32>
    %cst_24 = arith.constant dense<0.000000e+00> : vector<8x32xf32>
    %99 = tpu.matmul %98, %21, %cst_24 {dimension_numbers = #tpu.dot_dimension_numbers<[1], [0], [0], [1], [0, 0, 1, 1], [], []>} : vector<8x32xf32>, vector<32x32xf32>, vector<8x32xf32> -> vector<8x32xf32>
    %100 = vector.broadcast %17 : vector<1x32xf32> to vector<8x32xf32>
    %101 = arith.addf %99, %100 : vector<8x32xf32>
    %102 = arith.addf %23, %101 : vector<8x32xf32>
    %cst_25 = arith.constant dense<0.000000e+00> : vector<8xf32>
    %103 = vector.multi_reduction <add>, %102, %cst_25 [1] : vector<8x32xf32> to vector<8xf32>
    %104 = vector.shape_cast %103 : vector<8xf32> to vector<8x1xf32>
    %cst_26 = arith.constant 3.200000e+01 : f32
    %105 = vector.broadcast %cst_26 : f32 to vector<8x1xf32>
    %106 = arith.divf %104, %105 : vector<8x1xf32>
    %107 = vector.broadcast %106 : vector<8x1xf32> to vector<8x32xf32>
    %108 = arith.subf %102, %107 : vector<8x32xf32>
    %109 = arith.mulf %108, %108 : vector<8x32xf32>
    %cst_27 = arith.constant dense<0.000000e+00> : vector<8xf32>
    %110 = vector.multi_reduction <add>, %109, %cst_27 [1] : vector<8x32xf32> to vector<8xf32>
    %111 = vector.shape_cast %110 : vector<8xf32> to vector<8x1xf32>
    %cst_28 = arith.constant 3.200000e+01 : f32
    %112 = vector.broadcast %cst_28 : f32 to vector<8x1xf32>
    %113 = arith.divf %111, %112 : vector<8x1xf32>
    %cst_29 = arith.constant 9.99999974E-6 : f32
    %114 = vector.broadcast %cst_29 : f32 to vector<8x1xf32>
    %115 = arith.addf %113, %114 : vector<8x1xf32>
    %116 = math.rsqrt %115 : vector<8x1xf32>
    %117 = vector.broadcast %116 : vector<8x1xf32> to vector<8x32xf32>
    %118 = arith.mulf %108, %117 : vector<8x32xf32>
    %119 = vector.broadcast %15 : vector<1x32xf32> to vector<8x32xf32>
    %120 = arith.mulf %118, %119 : vector<8x32xf32>
    %121 = vector.broadcast %16 : vector<1x32xf32> to vector<8x32xf32>
    %122 = arith.addf %120, %121 : vector<8x32xf32>
    %cst_30 = arith.constant dense<0.000000e+00> : vector<8x128xf32>
    %123 = tpu.matmul %122, %6, %cst_30 {dimension_numbers = #tpu.dot_dimension_numbers<[1], [0], [0], [1], [0, 0, 1, 1], [], []>} : vector<8x32xf32>, vector<32x128xf32>, vector<8x128xf32> -> vector<8x128xf32>
    %124 = vector.broadcast %19 : vector<1x128xf32> to vector<8x128xf32>
    %125 = arith.addf %123, %124 : vector<8x128xf32>
    %cst_31 = arith.constant 5.000000e-01 : f32
    %126 = vector.broadcast %cst_31 : f32 to vector<8x128xf32>
    %127 = arith.mulf %126, %125 : vector<8x128xf32>
    %cst_32 = arith.constant 4.471500e-02 : f32
    %128 = vector.broadcast %cst_32 : f32 to vector<8x128xf32>
    %129 = arith.mulf %128, %125 : vector<8x128xf32>
    %130 = arith.mulf %129, %125 : vector<8x128xf32>
    %131 = arith.mulf %130, %125 : vector<8x128xf32>
    %132 = arith.addf %125, %131 : vector<8x128xf32>
    %cst_33 = arith.constant 0.797884583 : f32
    %133 = vector.broadcast %cst_33 : f32 to vector<8x128xf32>
    %134 = arith.mulf %133, %132 : vector<8x128xf32>
    %135 = math.tanh %134 : vector<8x128xf32>
    %cst_34 = arith.constant 1.000000e+00 : f32
    %136 = vector.broadcast %cst_34 : f32 to vector<8x128xf32>
    %137 = arith.addf %136, %135 : vector<8x128xf32>
    %138 = arith.mulf %127, %137 : vector<8x128xf32>
    "tpu.trace_start"() <{level = 10 : i32, message = "tk,ck->tc"}> : () -> ()
    %cst_35 = arith.constant dense<0.000000e+00> : vector<8x32xf32>
    %139 = tpu.matmul %138, %8, %cst_35 {dimension_numbers = #tpu.dot_dimension_numbers<[1], [1], [0], [0], [0, 0, 1, 0], [], []>} : vector<8x128xf32>, vector<32x128xf32>, vector<8x32xf32> -> vector<8x32xf32>
    "tpu.trace_stop"() : () -> ()
    %140 = vector.broadcast %18 : vector<1x32xf32> to vector<8x32xf32>
    %141 = arith.addf %139, %140 : vector<8x32xf32>
    %142 = arith.addf %102, %141 : vector<8x32xf32>
    %c0_36 = arith.constant 0 : index
    %c0_37 = arith.constant 0 : index
    %c0_38 = arith.constant 0 : index
    %143 = vector.load %arg3[%c0_36, %c0_37, %c0_38] : memref<2x8x32xf32, #tpu.memory_space<vmem>>, vector<1x8x32xf32>
    %144 = vector.shape_cast %143 : vector<1x8x32xf32> to vector<8x32xf32>
    %145 = vector.shape_cast %142 : vector<8x32xf32> to vector<1x8x32xf32>
    tpu.vector_store %arg3[%c0_36, %c0_37, %c0_38], %145 {strides = array<i32>} : memref<2x8x32xf32, #tpu.memory_space<vmem>>, vector<1x8x32xf32>,
    %c1 = arith.constant 1 : index
    %c0_39 = arith.constant 0 : index
    %c0_40 = arith.constant 0 : index
    %146 = vector.load %arg3[%c1, %c0_39, %c0_40] : memref<2x8x32xf32, #tpu.memory_space<vmem>>, vector<1x8x32xf32>
    %147 = vector.shape_cast %146 : vector<1x8x32xf32> to vector<8x32xf32>
    %cst_41 = arith.constant dense<0.000000e+00> : vector<8xf32>
    %148 = vector.multi_reduction <add>, %147, %cst_41 [1] : vector<8x32xf32> to vector<8xf32>
    %149 = vector.shape_cast %148 : vector<8xf32> to vector<8x1xf32>
    %cst_42 = arith.constant 3.200000e+01 : f32
    %150 = vector.broadcast %cst_42 : f32 to vector<8x1xf32>
    %151 = arith.divf %149, %150 : vector<8x1xf32>
    %152 = vector.broadcast %151 : vector<8x1xf32> to vector<8x32xf32>
    %153 = arith.subf %147, %152 : vector<8x32xf32>
    %154 = arith.mulf %153, %153 : vector<8x32xf32>
    %cst_43 = arith.constant dense<0.000000e+00> : vector<8xf32>
    %155 = vector.multi_reduction <add>, %154, %cst_43 [1] : vector<8x32xf32> to vector<8xf32>
    %156 = vector.shape_cast %155 : vector<8xf32> to vector<8x1xf32>
    %cst_44 = arith.constant 3.200000e+01 : f32
    %157 = vector.broadcast %cst_44 : f32 to vector<8x1xf32>
    %158 = arith.divf %156, %157 : vector<8x1xf32>
    %cst_45 = arith.constant 9.99999974E-6 : f32
    %159 = vector.broadcast %cst_45 : f32 to vector<8x1xf32>
    %160 = arith.addf %158, %159 : vector<8x1xf32>
    %161 = math.rsqrt %160 : vector<8x1xf32>
    %162 = vector.broadcast %161 : vector<8x1xf32> to vector<8x32xf32>
    %163 = arith.mulf %153, %162 : vector<8x32xf32>
    %164 = vector.broadcast %13 : vector<1x32xf32> to vector<8x32xf32>
    %165 = arith.mulf %163, %164 : vector<8x32xf32>
    %166 = vector.broadcast %14 : vector<1x32xf32> to vector<8x32xf32>
    %167 = arith.addf %165, %166 : vector<8x32xf32>
    %cst_46 = arith.constant dense<0.000000e+00> : vector<8x128xf32>
    %168 = tpu.matmul %167, %4, %cst_46 {dimension_numbers = #tpu.dot_dimension_numbers<[1], [0], [0], [1], [0, 0, 1, 1], [], []>} : vector<8x32xf32>, vector<32x128xf32>, vector<8x128xf32> -> vector<8x128xf32>
    %169 = vector.broadcast %20 : vector<1x128xf32> to vector<8x128xf32>
    %170 = arith.addf %168, %169 : vector<8x128xf32>
    %171 = vector.extract_strided_slice %170 {offsets = [0, 0], sizes = [8, 8], strides = [1, 1]} : vector<8x128xf32> to vector<8x8xf32>
    %172 = vector.extract_strided_slice %170 {offsets = [0, 8], sizes = [8, 8], strides = [1, 1]} : vector<8x128xf32> to vector<8x8xf32>
    %173 = vector.extract_strided_slice %170 {offsets = [0, 16], sizes = [8, 8], strides = [1, 1]} : vector<8x128xf32> to vector<8x8xf32>
    %174 = vector.extract_strided_slice %170 {offsets = [0, 24], sizes = [8, 8], strides = [1, 1]} : vector<8x128xf32> to vector<8x8xf32>
    %175 = vector.shape_cast %171 : vector<8x8xf32> to vector<1x8x8xf32>
    %176 = vector.shape_cast %172 : vector<8x8xf32> to vector<1x8x8xf32>
    %177 = vector.shape_cast %173 : vector<8x8xf32> to vector<1x8x8xf32>
    %178 = vector.shape_cast %174 : vector<8x8xf32> to vector<1x8x8xf32>
    %179 = tpu.concatenate %175, %176, %177, %178 in 0 : vector<1x8x8xf32>, vector<1x8x8xf32>, vector<1x8x8xf32>, vector<1x8x8xf32> -> vector<4x8x8xf32>
    %180 = vector.extract_strided_slice %170 {offsets = [0, 32], sizes = [8, 8], strides = [1, 1]} : vector<8x128xf32> to vector<8x8xf32>
    %181 = vector.extract_strided_slice %170 {offsets = [0, 40], sizes = [8, 8], strides = [1, 1]} : vector<8x128xf32> to vector<8x8xf32>
    %182 = vector.extract_strided_slice %170 {offsets = [0, 48], sizes = [8, 8], strides = [1, 1]} : vector<8x128xf32> to vector<8x8xf32>
    %183 = vector.extract_strided_slice %170 {offsets = [0, 56], sizes = [8, 8], strides = [1, 1]} : vector<8x128xf32> to vector<8x8xf32>
    %184 = vector.shape_cast %180 : vector<8x8xf32> to vector<1x8x8xf32>
    %185 = vector.shape_cast %181 : vector<8x8xf32> to vector<1x8x8xf32>
    %186 = vector.shape_cast %182 : vector<8x8xf32> to vector<1x8x8xf32>
    %187 = vector.shape_cast %183 : vector<8x8xf32> to vector<1x8x8xf32>
    %188 = tpu.concatenate %184, %185, %186, %187 in 0 : vector<1x8x8xf32>, vector<1x8x8xf32>, vector<1x8x8xf32>, vector<1x8x8xf32> -> vector<4x8x8xf32>
    %189 = vector.extract_strided_slice %170 {offsets = [0, 64], sizes = [8, 8], strides = [1, 1]} : vector<8x128xf32> to vector<8x8xf32>
    %190 = vector.extract_strided_slice %170 {offsets = [0, 72], sizes = [8, 8], strides = [1, 1]} : vector<8x128xf32> to vector<8x8xf32>
    %191 = vector.extract_strided_slice %170 {offsets = [0, 80], sizes = [8, 8], strides = [1, 1]} : vector<8x128xf32> to vector<8x8xf32>
    %192 = vector.extract_strided_slice %170 {offsets = [0, 88], sizes = [8, 8], strides = [1, 1]} : vector<8x128xf32> to vector<8x8xf32>
    %193 = vector.shape_cast %189 : vector<8x8xf32> to vector<1x8x8xf32>
    %194 = vector.shape_cast %190 : vector<8x8xf32> to vector<1x8x8xf32>
    %195 = vector.shape_cast %191 : vector<8x8xf32> to vector<1x8x8xf32>
    %196 = vector.shape_cast %192 : vector<8x8xf32> to vector<1x8x8xf32>
    %197 = tpu.concatenate %193, %194, %195, %196 in 0 : vector<1x8x8xf32>, vector<1x8x8xf32>, vector<1x8x8xf32>, vector<1x8x8xf32> -> vector<4x8x8xf32>
    "tpu.trace_start"() <{level = 10 : i32, message = "hqd,hkd->hqk"}> : () -> ()
    %cst_47 = arith.constant dense<0.000000e+00> : vector<4x8x8xf32>
    %198 = tpu.matmul %179, %188, %cst_47 {dimension_numbers = #tpu.dot_dimension_numbers<[2], [2], [1], [1], [0, 0, 0, 1, 1, 1], [0], [0]>} : vector<4x8x8xf32>, vector<4x8x8xf32>, vector<4x8x8xf32> -> vector<4x8x8xf32>
    "tpu.trace_stop"() : () -> ()
    %cst_48 = arith.constant 0.353553385 : f32
    %199 = vector.broadcast %cst_48 : f32 to vector<4x8x8xf32>
    %200 = arith.mulf %198, %199 : vector<4x8x8xf32>
    %201 = vector.shape_cast %12 : vector<8x8xf32> to vector<1x8x8xf32>
    %202 = vector.broadcast %201 : vector<1x8x8xf32> to vector<4x8x8xf32>
    %203 = arith.addf %200, %202 : vector<4x8x8xf32>
    %cst_49 = arith.constant dense<0xFF800000> : vector<4x8xf32>
    %204 = vector.multi_reduction <maximumf>, %203, %cst_49 [2] : vector<4x8x8xf32> to vector<4x8xf32>
    %205 = vector.shape_cast %204 : vector<4x8xf32> to vector<4x8x1xf32>
    %206 = vector.broadcast %205 : vector<4x8x1xf32> to vector<4x8x8xf32>
    %207 = arith.subf %203, %206 : vector<4x8x8xf32>
    %208 = math.exp %207 : vector<4x8x8xf32>
    %cst_50 = arith.constant dense<0.000000e+00> : vector<4x8xf32>
    %209 = vector.multi_reduction <add>, %208, %cst_50 [2] : vector<4x8x8xf32> to vector<4x8xf32>
    %210 = vector.shape_cast %209 : vector<4x8xf32> to vector<4x8x1xf32>
    %211 = vector.broadcast %210 : vector<4x8x1xf32> to vector<4x8x8xf32>
    %212 = arith.divf %208, %211 : vector<4x8x8xf32>
    "tpu.trace_start"() <{level = 10 : i32, message = "hqk,hkd->hqd"}> : () -> ()
    %cst_51 = arith.constant dense<0.000000e+00> : vector<4x8x8xf32>
    %213 = tpu.matmul %212, %197, %cst_51 {dimension_numbers = #tpu.dot_dimension_numbers<[2], [1], [1], [2], [0, 0, 0, 1, 1, 2], [0], [0]>} : vector<4x8x8xf32>, vector<4x8x8xf32>, vector<4x8x8xf32> -> vector<4x8x8xf32>
    "tpu.trace_stop"() : () -> ()
    %214 = vector.extract_strided_slice %213 {offsets = [0, 0, 0], sizes = [1, 8, 8], strides = [1, 1, 1]} : vector<4x8x8xf32> to vector<1x8x8xf32>
    %215 = vector.shape_cast %214 : vector<1x8x8xf32> to vector<8x8xf32>
    %216 = vector.extract_strided_slice %213 {offsets = [1, 0, 0], sizes = [1, 8, 8], strides = [1, 1, 1]} : vector<4x8x8xf32> to vector<1x8x8xf32>
    %217 = vector.shape_cast %216 : vector<1x8x8xf32> to vector<8x8xf32>
    %218 = vector.extract_strided_slice %213 {offsets = [2, 0, 0], sizes = [1, 8, 8], strides = [1, 1, 1]} : vector<4x8x8xf32> to vector<1x8x8xf32>
    %219 = vector.shape_cast %218 : vector<1x8x8xf32> to vector<8x8xf32>
    %220 = vector.extract_strided_slice %213 {offsets = [3, 0, 0], sizes = [1, 8, 8], strides = [1, 1, 1]} : vector<4x8x8xf32> to vector<1x8x8xf32>
    %221 = vector.shape_cast %220 : vector<1x8x8xf32> to vector<8x8xf32>
    %222 = tpu.concatenate %215, %217, %219, %221 in 1 : vector<8x8xf32>, vector<8x8xf32>, vector<8x8xf32>, vector<8x8xf32> -> vector<8x32xf32>
    %cst_52 = arith.constant dense<0.000000e+00> : vector<8x32xf32>
    %223 = tpu.matmul %222, %21, %cst_52 {dimension_numbers = #tpu.dot_dimension_numbers<[1], [0], [0], [1], [0, 0, 1, 1], [], []>} : vector<8x32xf32>, vector<32x32xf32>, vector<8x32xf32> -> vector<8x32xf32>
    %224 = vector.broadcast %17 : vector<1x32xf32> to vector<8x32xf32>
    %225 = arith.addf %223, %224 : vector<8x32xf32>
    %226 = arith.addf %147, %225 : vector<8x32xf32>
    %cst_53 = arith.constant dense<0.000000e+00> : vector<8xf32>
    %227 = vector.multi_reduction <add>, %226, %cst_53 [1] : vector<8x32xf32> to vector<8xf32>
    %228 = vector.shape_cast %227 : vector<8xf32> to vector<8x1xf32>
    %cst_54 = arith.constant 3.200000e+01 : f32
    %229 = vector.broadcast %cst_54 : f32 to vector<8x1xf32>
    %230 = arith.divf %228, %229 : vector<8x1xf32>
    %231 = vector.broadcast %230 : vector<8x1xf32> to vector<8x32xf32>
    %232 = arith.subf %226, %231 : vector<8x32xf32>
    %233 = arith.mulf %232, %232 : vector<8x32xf32>
    %cst_55 = arith.constant dense<0.000000e+00> : vector<8xf32>
    %234 = vector.multi_reduction <add>, %233, %cst_55 [1] : vector<8x32xf32> to vector<8xf32>
    %235 = vector.shape_cast %234 : vector<8xf32> to vector<8x1xf32>
    %cst_56 = arith.constant 3.200000e+01 : f32
    %236 = vector.broadcast %cst_56 : f32 to vector<8x1xf32>
    %237 = arith.divf %235, %236 : vector<8x1xf32>
    %cst_57 = arith.constant 9.99999974E-6 : f32
    %238 = vector.broadcast %cst_57 : f32 to vector<8x1xf32>
    %239 = arith.addf %237, %238 : vector<8x1xf32>
    %240 = math.rsqrt %239 : vector<8x1xf32>
    %241 = vector.broadcast %240 : vector<8x1xf32> to vector<8x32xf32>
    %242 = arith.mulf %232, %241 : vector<8x32xf32>
    %243 = vector.broadcast %15 : vector<1x32xf32> to vector<8x32xf32>
    %244 = arith.mulf %242, %243 : vector<8x32xf32>
    %245 = vector.broadcast %16 : vector<1x32xf32> to vector<8x32xf32>
    %246 = arith.addf %244, %245 : vector<8x32xf32>
    %cst_58 = arith.constant dense<0.000000e+00> : vector<8x128xf32>
    %247 = tpu.matmul %246, %6, %cst_58 {dimension_numbers = #tpu.dot_dimension_numbers<[1], [0], [0], [1], [0, 0, 1, 1], [], []>} : vector<8x32xf32>, vector<32x128xf32>, vector<8x128xf32> -> vector<8x128xf32>
    %248 = vector.broadcast %19 : vector<1x128xf32> to vector<8x128xf32>
    %249 = arith.addf %247, %248 : vector<8x128xf32>
    %cst_59 = arith.constant 5.000000e-01 : f32
    %250 = vector.broadcast %cst_59 : f32 to vector<8x128xf32>
    %251 = arith.mulf %250, %249 : vector<8x128xf32>
    %cst_60 = arith.constant 4.471500e-02 : f32
    %252 = vector.broadcast %cst_60 : f32 to vector<8x128xf32>
    %253 = arith.mulf %252, %249 : vector<8x128xf32>
    %254 = arith.mulf %253, %249 : vector<8x128xf32>
    %255 = arith.mulf %254, %249 : vector<8x128xf32>
    %256 = arith.addf %249, %255 : vector<8x128xf32>
    %cst_61 = arith.constant 0.797884583 : f32
    %257 = vector.broadcast %cst_61 : f32 to vector<8x128xf32>
    %258 = arith.mulf %257, %256 : vector<8x128xf32>
    %259 = math.tanh %258 : vector<8x128xf32>
    %cst_62 = arith.constant 1.000000e+00 : f32
    %260 = vector.broadcast %cst_62 : f32 to vector<8x128xf32>
    %261 = arith.addf %260, %259 : vector<8x128xf32>
    %262 = arith.mulf %251, %261 : vector<8x128xf32>
    "tpu.trace_start"() <{level = 10 : i32, message = "tk,ck->tc"}> : () -> ()
    %cst_63 = arith.constant dense<0.000000e+00> : vector<8x32xf32>
    %263 = tpu.matmul %262, %8, %cst_63 {dimension_numbers = #tpu.dot_dimension_numbers<[1], [1], [0], [0], [0, 0, 1, 0], [], []>} : vector<8x128xf32>, vector<32x128xf32>, vector<8x32xf32> -> vector<8x32xf32>
    "tpu.trace_stop"() : () -> ()
    %264 = vector.broadcast %18 : vector<1x32xf32> to vector<8x32xf32>
    %265 = arith.addf %263, %264 : vector<8x32xf32>
    %266 = arith.addf %226, %265 : vector<8x32xf32>
    %c1_64 = arith.constant 1 : index
    %c0_65 = arith.constant 0 : index
    %c0_66 = arith.constant 0 : index
    %267 = vector.load %arg3[%c1_64, %c0_65, %c0_66] : memref<2x8x32xf32, #tpu.memory_space<vmem>>, vector<1x8x32xf32>
    %268 = vector.shape_cast %267 : vector<1x8x32xf32> to vector<8x32xf32>
    %269 = vector.shape_cast %266 : vector<8x32xf32> to vector<1x8x32xf32>
    tpu.vector_store %arg3[%c1_64, %c0_65, %c0_66], %269 {strides = array<i32>} : memref<2x8x32xf32, #tpu.memory_space<vmem>>, vector<1x8x32xf32>,
    return
  }
  func.func @transform_0(%arg0: i32) -> (i32, i32, i32) {
    %c0_i32 = arith.constant 0 : i32
    %c0_i32_0 = arith.constant 0 : i32
    %c0_i32_1 = arith.constant 0 : i32
    %c0_i32_2 = arith.constant 0 : i32
    return %c0_i32, %c0_i32_0, %c0_i32_1 : i32, i32, i32
  }
  func.func @transform_1(%arg0: i32) -> (i32, i32, i32) {
    %c0_i32 = arith.constant 0 : i32
    %c0_i32_0 = arith.constant 0 : i32
    %c0_i32_1 = arith.constant 0 : i32
    return %arg0, %c0_i32, %c0_i32_0 : i32, i32, i32
  }
  func.func @transform_2(%arg0: i32) -> (i32, i32, i32) {
    %c0_i32 = arith.constant 0 : i32
    %c0_i32_0 = arith.constant 0 : i32
    %c0_i32_1 = arith.constant 0 : i32
    %c0_i32_2 = arith.constant 0 : i32
    return %c0_i32, %c0_i32_0, %c0_i32_1 : i32, i32, i32
  }
}

</mosaic_0001>

<bundles_post_ra>
// kernel: tpu_custom_call.1
= control target key start
LH: loop header
LB: loop body
LE: loop exit
PB: predicated region body
PF: predicated region fallthrough
CT: control target
= control target key end

     0   :  { %7 = vsyncpa [#allocation3], 0  ;;  %s3483_s0 = inlined_call_operand.hbm [shape: f32[2,8,32], index: 0, kind: input, shape index: {}]   ;;  %s3484_s1 = inlined_call_operand.hbm [shape: f32[2,112,128], index: 1, kind: input, shape index: {}]   ;;  %s3485_s2 = inlined_call_operand.hbm [shape: f32[2,8,32], index: 2, kind: output, shape index: {}]  }
   0x1   :  { %8 = vsyncpa [#allocation6], 0 }
   0x2   :  { %10 = vsyncpa [#allocation6 + $0x1], 0 }
   0x3   :  { %11 = vsyncpa [#allocation4], 0  ;;  %s2961_s9 = smov 0   ;;  %s2963_s10 = smov 0  }
   0x4   :  { %s2965_s11 = smov 0   ;;  %s2967_s12 = smov 0  }
   0x5 LB: > { %s2980_s13 = sadd.s32 4294967295, %s2926_s12   ;;  %p58_p0 = scmp.ne.s32.totalorder %s2918_s10, %s2914_s9  ;;  %s2926_s12 = sphi %s2967_s12, %s3501_s12   ;;  %s2922_s11 = sphi %s2965_s11, %s3500_s11   ;;  %s2918_s10 = sphi %s2963_s10, %s3499_s10   ;;  %s2914_s9 = sphi %s2961_s9, %s3498_s9  }
   0x6   : > { %p3486_p1 = scmp.eq.s32.totalorder %s2980_s13, 0  ;;  %p2342_p2 = scmp.ge.s32.totalorder %s2926_s12, 1 }
   0x7   : > { %p90_p3 = scmp.lt.s32.totalorder %s2926_s12, 3  ;;  %s2928_s16 = smov [#allocation2]  }
   0x8   : > { %p2989_p5 = por %p3486_p1, %p58_p0  ;;  %s102_s17 = sshll.u32 %s2928_s16, 4  ;;  %s103_s17 = int_to_ptr.vmem [resolvable:$true] %s102_s17 }
   0x9   : > { %p2993_p6 = pnand %p2342_p2, %p90_p3  ;;  %s3006_s19 = sadd.s32 1, %s2926_s12  }
   0xa   : > { %s3489_s14 = scalar_select %p2989_p5, 1, 0 }
   0xb   : > { %s3490_s15 = scalar_select %p2993_p6, 1, 0 }
   0xc   : > { %p2684_p7 = pneg %p2993_p6  ;;  %s45_s20 = sadd.s32 1, %s2922_s11 }
   0xd   : > { %s42_s21 = ssub.s32 %s2926_s12, %s3006_s19  ;;  %s2800_s24 = scalar_lea.hbm %s3483_s0, 256 }
   0xe   : > { %p3001_p8 = pnand %p2684_p7, %p3486_p1  ;;  %p2801_p9 = scmp.ne.s32.totalorder %s3483_s0, %s2800_s24 }
   0xf   : > { %p2807_p13 = scmp.lt.u32.totalorder %s2800_s24, %s3483_s0 }
  0x10   : > { %p2802_p10 = pneg %p3001_p8 }
  0x12   : > { %p2803_p11 = pnand %p2802_p10, %p2801_p9 }
  0x14   : > { %p2804_p12 = pneg %p2803_p11 }
  0x16   : > { %p2809_p0 = pnand %p2807_p13, %p2804_p12 }
  0x18   : > { %2812 = shalt.err (!%p2809_p0)
}
  0x19   : > { %s2813_s29 = scalar_lea.vmem %s103_s17, 256  ;;  %p2821_p4 = scmp.lt.s32.totalorder %s103_s17, %s103_s17 }
  0x1a   : > { %p2814_p2 = scmp.ne.s32.totalorder %s103_s17, %s2813_s29  ;;  %p2822_p1 = scmp.lt.s32.totalorder %s2813_s29, %s2813_s29 }
  0x1c   : > { %p2816_p3 = pnand %p2814_p2, %p2802_p10  ;;  %p2823_p5 = por %p2822_p1, %p2821_p4 }
  0x1e   : > { %p2817_p7 = pneg %p2816_p3 }
  0x20   : > { %p2824_p6 = pnand %p2823_p5, %p2817_p7 }
  0x22   : > { %2827 = shalt.err (!%p2824_p6)
}
  0x23   : > { %s2929_s30 = smov 128   ;;  %s2930_s3 = smov 8  }
  0x24   : > { %2687 = dma.hbm_to_vmem [thread:$0]  (!%p3001_p8), %s3483_s0, 256, %s103_s17, [#allocation3], %s2929_s30, %s2929_s30, %s2930_s3  }
  0x25   : > { %p43_p1 = scmp.eq.s32.totalorder %s42_s21, 0  ;;  %p52_p4 = scmp.ne.s32.totalorder %s2922_s11, %s2918_s10 }
  0x26   : > { %p53_p5 = scmp.eq.s32.totalorder %s2926_s12, 0  ;;  %p2693_p6 = scmp.lt.s32.totalorder %s2926_s12, 2 }
  0x27   : > { %s3035_s6 = scalar_select %p43_p1, %s2922_s11, %s45_s20  }
  0x28   : > { %p54_p9 = por %p53_p5, %p52_p4  ;;  %s116_s7 = sand.u32 1, %s2922_s11  }
  0x29   : > { %s2671_s8 = smul.u32 112, %s116_s7  ;;  %s2833_s26 = scalar_lea.hbm %s3484_s1, 3584 }
  0x2a   : > { %s2672_s9 = smul.u32 1792, %s2926_s12  ;;  %p3039_p10 = pnand %p2693_p6, %p54_p9 }
  0x2b   : > { %s120_s20 = scalar_lea.vmem [#allocation5], %s2671_s8  ;;  %s3050_s12 = scalar_lea.sflag [#allocation6], %s116_s7 }
  0x2c   : > { %s3046_s17 = scalar_lea.hbm %s3484_s1, %s2672_s9  ;;  %s127_s21 = sshll.u32 %s120_s20, 4  ;;  %s3048_s21 = int_to_ptr.vmem [resolvable:$true] %s127_s21 }
  0x2d   : > { %s2828_s23 = scalar_lea.hbm %s3046_s17, 1792  ;;  %p2830_p11 = pneg %p3039_p10 }
  0x2e   : > { %p2829_p8 = scmp.ne.s32.totalorder %s3046_s17, %s2828_s23  ;;  %p2834_p0 = scmp.lt.u32.totalorder %s3046_s17, %s3484_s1 }
  0x2f   : > { %p2835_p2 = scmp.lt.u32.totalorder %s2833_s26, %s2828_s23  ;;  %p2837_p7 = scmp.lt.u32.totalorder %s2828_s23, %s3046_s17 }
  0x30   : > { %p2831_p12 = pnand %p2830_p11, %p2829_p8 }
  0x31   : > { %p2836_p3 = por %p2835_p2, %p2834_p0 }
  0x32   : > { %p2832_p13 = pneg %p2831_p12 }
  0x33   : > { %p2838_p1 = por %p2837_p7, %p2836_p3 }
  0x35   : > { %p2839_p4 = pnand %p2838_p1, %p2832_p13 }
  0x37   : > { %2842 = shalt.err (!%p2839_p4)
}
  0x38   : > { %s2843_s29 = scalar_lea.vmem %s3048_s21, 1792  ;;  %s2931_s4 = smov [#allocation5]  }
  0x39   : > { %p2844_p5 = scmp.ne.s32.totalorder %s3048_s21, %s2843_s29  ;;  %s2848_s5 = sshll.u32 %s2931_s4, 4  ;;  %s2849_s5 = int_to_ptr.vmem [resolvable:$false] %s2848_s5 }
  0x3a   : > { %s2850_s7 = scalar_lea.vmem %s2849_s5, 3584  ;;  %p2851_p8 = scmp.lt.s32.totalorder %s3048_s21, %s2849_s5 }
  0x3b   : > { %p2846_p6 = pnand %p2844_p5, %p2830_p11  ;;  %p2852_p12 = scmp.lt.s32.totalorder %s2850_s7, %s2843_s29 }
  0x3d   : > { %p2847_p9 = pneg %p2846_p6  ;;  %p2853_p0 = por %p2852_p12, %p2851_p8 }
  0x3f   : > { %p2854_p2 = pnand %p2853_p0, %p2847_p9 }
  0x41   : > { %2857 = shalt.err (!%p2854_p2)
}
  0x42   : > { %2691 = dma.hbm_to_vmem [thread:$0]  (!%p3039_p10), %s3046_s17, 1792, %s3048_s21, %s3050_s12, %s2929_s30, %s2929_s30, %s2930_s3  }
  0x43   : > { %p3493_p11 = scmp.ne.s32.totalorder %s3490_s15, 0 }
  0x44   : > { %p3494_p13 = scmp.eq.s32.totalorder (!%p3493_p11), %s2980_s13, 0 }
  0x45   : > { %139 = sbr.rel (%p3493_p11) target bundleno = 4565 (0x11d5), region = 28 }
  0x4c   : > { %2901 = dma.done.wait (%p3494_p13), [#allocation3], 256   ;;  %p3495_p3 = pmov %p3494_p13 }
  0x4d   : > { %s145_s8 = sand.u32 1, %s2918_s10   ;;  %p3496_p7 = scmp.ne.s32.totalorder %s3489_s14, 0 }
  0x4e   : > { %2903 = vsyncadd (%p3495_p3), [#allocation3], 4294967040  ;;  %s2673_s9 = smul.u32 112, %s145_s8  ;;  %s146_s16 = scalar_lea.sflag [#allocation6], %s145_s8 }
  0x50   : > { %s3088_s18 = scalar_lea.vmem [#allocation5], %s2673_s9 }
  0x51   : > { %2905 = dma.done.wait (%p3496_p7), %s146_s16, 1792  }
  0x52   : > { %2907 = vsyncadd (%p3496_p7), %s146_s16, 4294965504  ;;  %p3497_p10 = scmp.ne.s32.totalorder %s2980_s13, 0 }
  0x53   : > { %v169_v0 = vld [vmem:[#allocation2] sm:$0xff] (!%p3497_p10)  ;;  %vm171_vm0 = vcmask (!%p3497_p10), 261120   ;;  %v170_v1 = vld [vmem:[#allocation2 + $0x8] sm:$0xff] (!%p3497_p10) }
  0x54   : > { %168 = sbr.rel (%p3497_p10) target bundleno = 91 (0x5b), region = 40  ;;  %172 = vst.msk [vmem:[#allocation7] sm:$0xff] (!%p3497_p10), %vm171_vm0, %v169_v0  ;;  %173 = vst.msk [vmem:[#allocation7 + $0x8] sm:$0xff] (!%p3497_p10), %vm171_vm0, %v170_v1 }
  0x5b PF: > { %v3096_v2 = vld [vmem:[#allocation7] sm:$0xff]  ;;  %vm189_vm1 = vcmask 261120   ;;  %v3106_v10 = vld [vmem:[%s3088_s18 + $0x8] sm:$0xff]  ;;  %v2932_v12 = vmov 0.0|0.0   ;;  %v3119_v15 = vld [vmem:[%s3088_s18 + $0x18] sm:$0xff]  ;;  %vm2933_vm2 = vmmov 0   ;;  %v204_v20 = vlaneseq }
  0x5c   : > { %v190_v3 = vsel %vm189_vm1, %v3096_v2, 0.0  ;;  %v3103_v9 = vld [vmem:[%s3088_s18] sm:$0xff]  ;;  %v3109_v11 = vld [vmem:[%s3088_s18 + $0x10] sm:$0xff]  ;;  %2623 = vmatprep.subr.bf16.mxu1 %v2932_v12  ;;  %v2934_v16 = vmov 0.0   ;;  %s2935_s14 = smov 104   ;;  %s2936_s15 = smov 120  }
  0x5d   : > { %191 = vadd.xlane.f32.xlu0 %v190_v3  ;;  %v2746_v13 = vpack.i.bf16 %v3106_v10, %v3103_v9  ;;  %v3116_v14 = vpack.c.bf16 %v3106_v10, %v3103_v9  ;;  %2463 = vmatprep.mubr.msk.f32.mxu1 %vm2933_vm2, %v2934_v16  ;;  %v3129_v17 = vpack.c.bf16 %v3119_v15, %v3109_v11  ;;  %v3134_v22 = vshrl.u32 %v204_v20, 7  ;;  %v3138_v24 = vld [vmem:[%s3088_s18 + $0x60] sm:$0xff]  ;;  %s2937_s30 = smov 112   ;;  %s2938_s3 = smov 96   ;;  %v3197_v45 = vld [vmem:[%s3088_s18 + $0x68] sm:$0xff] }
  0x5e   : > { %2476 = vmatprep.subr.mxu0 %v2934_v16  ;;  %2478 = vmatprep.mubr.msk.f32.mxu0 %vm2933_vm2, %v2934_v16  ;;  %vm300_vm3 = vcmask 64512   ;;  %s2939_s22 = smov 64   ;;  %s2940_s17 = smov 32   ;;  %vm972_vm4 = vcmask 130048   ;;  %vm974_vm5 = vcmask 195584  }
  0x5f   : > { %2625 = vmatpush3.bf16.msra.mxu1 %v3116_v14  ;;  %v206_v23 = vsub.s32 0, %v3134_v22  ;;  %v211_v25 = vsub.s32 1, %v3134_v22  ;;  %v216_v32 = vsub.s32 7, %v3134_v22  ;;  %s2941_s20 = smov 8   ;;  %s2942_s21 = smov 16  }
  0x60   : > { %2626 = vmatprep.subr.bf16.mxu1 %v2932_v12  ;;  %s2943_s12 = smov 24   ;;  %s2944_s23 = smov [#allocation7]  }
  0x61   : > { %v3142_v26 = vrot.slane %v3138_v24, %v206_v23  ;;  %v3145_v29 = vrot.slane %v3138_v24, %v211_v25  ;;  %v3154_v33 = vrot.slane %v3138_v24, %v216_v32  ;;  %s2276_s24 = sshll.u32 %s2944_s23, 4  ;;  %p2695_p1 = scmp.eq.s32.totalorder %s2980_s13, 1  ;;  %s2277_s24 = int_to_ptr.vmem [resolvable:$true] %s2276_s24 }
  0x62   : > { %s2858_s25 = scalar_lea.vmem %s2277_s24, 256  ;;  %p2865_p9 = scmp.lt.s32.totalorder %s2277_s24, %s2277_s24 }
  0x63   : > { %2628 = vmatpush3.bf16.msra.mxu1 %v3129_v17  ;;  %p2859_p4 = scmp.ne.s32.totalorder %s2277_s24, %s2858_s25  ;;  %p2866_p8 = scmp.lt.s32.totalorder %s2858_s25, %s2858_s25 }
  0x64   : > { %2466 = vmatprep.subr.mxu1 %v2934_v16 }
  0x65   : > { %p2860_p5 = pnand %p2859_p4, %p2695_p1  ;;  %p2867_p12 = por %p2866_p8, %p2865_p9 }
  0x67   : > { %p2861_p6 = pneg %p2860_p5 }
  0x69   : > { %p2868_p0 = pnand %p2867_p12, %p2861_p6 }
  0xea   : > { %v192_v4 = vpop.xlane.xlu0 %191 }
  0xeb   : > { %v194_v5 = vmul.f32 0.03125, %v192_v4 }
  0xed   : > { %v195_v6 = vsub.f32 %v3096_v2, %v194_v5 }
  0xef   : > { %v196_v7 = vmul.f32 %v195_v6, %v195_v6 }
  0xf1   : > { %v197_v8 = vsel %vm189_vm1, %v196_v7, 0.0 }
  0xf2   : > { %198 = vadd.xlane.f32.xlu0 %v197_v8 }
 0x17f   : > { %v199_v18 = vpop.xlane.xlu0 %198 }
 0x180   : > { %v200_v19 = vmul.f32 0.03125, %v199_v18 }
 0x182   : > { %v201_v21 = vadd.f32 1e-05, %v200_v19 }
 0x184   : > { %2756 = vrsqrt.f32 %v201_v21 }
 0x18e   : > { %v2757_v27 = vpop.eup %2756 }
 0x18f   : > { %v203_v28 = vmul.f32 %v2757_v27, %v195_v6 }
 0x191   : > { %v208_v30 = vmul.f32 %v3142_v26, %v203_v28 }
 0x193   : > { %v213_v31 = vadd.f32 %v3145_v29, %v208_v30 }
 0x195   : > { %2464 = vmatmul.mubr.msk.f32.vlgmr.msra.gmra.mrb[0].mxu1 %vm189_vm1, %v213_v31 }
 0x196   : > { %2468 = vmatprep.mubr.msk.f32.mxu1 %vm2933_vm2, %v2934_v16 }
 0x268   : > { %v287_v34 = vpop.f32.mrb[0].mxu1 }
 0x269   : > { %v288_v35 = vadd.f32 %v287_v34, %v3154_v33  ;;  %v2465_v36 = vpop.f32.mrb[1].mxu1 }
 0x26b   : > { %296 = vrot.lane.b32.xlu0 %v288_v35, %s2935_s14  ;;  %292 = vrot.lane.b32.xlu1 %v288_v35, %s2936_s15 }
 0x26f   : > { %294 = vrot.lane.b32.xlu1 %v288_v35, %s2937_s30 }
 0x273   : > { %298 = vrot.lane.b32.xlu1 %v288_v35, %s2938_s3 }
 0x2dd   : > { %v3161_v37 = vpop.permute.xlu1 %292  ;;  %v3169_v39 = vpop.permute.xlu0 %296 }
 0x2de   : > { %375 = vrot.lane.b32.xlu1 %v3161_v37, %s2938_s3 }
 0x2e1   : > { %v3165_v38 = vpop.permute.xlu1 %294 }
 0x2e2   : > { %451 = vrot.lane.b32.xlu1 %v3165_v38, %s2938_s3 }
 0x2e5   : > { %v299_v40 = vpop.permute.xlu1 %298 }
 0x2e6   : > { %527 = vrot.lane.b32.xlu1 %v3169_v39, %s2938_s3  ;;  %2467 = vmatpush3.xpose.msk.msra.mxu1 %vm300_vm3, %v299_v40 }
 0x2e7   : > { %2471 = vmatprep.subr.mxu1 %v2934_v16 }
 0x2e9   : > { %2469 = vmatmul.mubr.msk.f32.vlgmr.msra.gmra.mrb[2].mxu1 %vm300_vm3, %v288_v35 }
 0x2ea   : > { %2473 = vmatprep.mubr.msk.f32.mxu1 %vm2933_vm2, %v2934_v16 }
 0x350   : > { %v376_v41 = vpop.permute.xlu1 %375 }
 0x351   : > { %2472 = vmatpush3.xpose.msk.msra.mxu1 %vm300_vm3, %v376_v41 }
 0x352   : > { %2481 = vmatprep.subr.mxu1 %v2934_v16 }
 0x354   : > { %2474 = vmatmul.mubr.msk.f32.vlgmr.msra.gmra.mrb[4].mxu1 %vm300_vm3, %v3161_v37  ;;  %v452_v42 = vpop.permute.xlu1 %451 }
 0x355   : > { %2477 = vmatpush3.xpose.msk.msra.mxu0 %vm300_vm3, %v452_v42  ;;  %2483 = vmatprep.mubr.msk.f32.mxu1 %vm2933_vm2, %v2934_v16 }
 0x356   : > { %2486 = vmatprep.subr.mxu0 %v2934_v16 }
 0x358   : > { %2479 = vmatmul.mubr.msk.f32.vlgmr.msra.gmra.mrb[0].mxu0 %vm300_vm3, %v3165_v38  ;;  %v528_v43 = vpop.permute.xlu1 %527 }
 0x359   : > { %2482 = vmatpush3.xpose.msk.msra.mxu1 %vm300_vm3, %v528_v43  ;;  %2488 = vmatprep.mubr.msk.f32.mxu0 %vm2933_vm2, %v2934_v16 }
 0x35a   : > { %2491 = vmatprep.subr.mxu1 %v2934_v16 }
 0x35c   : > { %2484 = vmatmul.mubr.msk.f32.vlgmr.msra.gmra.mrb[6].mxu1 %vm300_vm3, %v3169_v39 }
 0x35d   : > { %2493 = vmatprep.mubr.msk.f32.mxu1 %vm2933_vm2, %v2934_v16 }
 0x3bc   : > { %v371_v44 = vpop.f32.mrb[2].mxu1 }
 0x3bd   : > { %v603_v46 = vmul.f32 0.35355338, %v371_v44  ;;  %v2470_v47 = vpop.f32.mrb[3].mxu1 }
 0x3bf   : > { %v607_v48 = vadd.f32 %v603_v46, %v3197_v45 }
 0x3c1   : > { %v611_v49 = vsel %vm300_vm3, %v607_v48, -inf }
 0x3c2   : > { %612 = vmax.xlane.f32.xlu1 %v611_v49 }
 0x427   : > { %v447_v50 = vpop.f32.mrb[4].mxu1 }
 0x428   : > { %v604_v51 = vmul.f32 0.35355338, %v447_v50  ;;  %v2475_v52 = vpop.f32.mrb[5].mxu1  ;;  %v2751_v50 = vpack.i.bf16 %v3119_v15, %v3109_v11 }
 0x42a   : > { %v608_v53 = vadd.f32 %v604_v51, %v3197_v45 }
 0x42b   : > { %v523_v54 = vpop.f32.mrb[0].mxu0 }
 0x42c   : > { %v605_v55 = vmul.f32 0.35355338, %v523_v54  ;;  %v2480_v56 = vpop.f32.mrb[1].mxu0  ;;  %v614_v57 = vsel %vm300_vm3, %v608_v53, -inf }
 0x42d   : > { %615 = vmax.xlane.f32.xlu0 %v614_v57 }
 0x42e   : > { %v609_v58 = vadd.f32 %v605_v55, %v3197_v45 }
 0x42f   : > { %v599_v59 = vpop.f32.mrb[6].mxu1 }
 0x430   : > { %v606_v60 = vmul.f32 0.35355338, %v599_v59  ;;  %v2485_v61 = vpop.f32.mrb[7].mxu1  ;;  %v617_v62 = vsel %vm300_vm3, %v609_v58, -inf }
 0x431   : > { %618 = vmax.xlane.f32.xlu1 %v617_v62 }
 0x432   : > { %v610_v63 = vadd.f32 %v606_v60, %v3197_v45 }
 0x434   : > { %v620_v0 = vsel %vm300_vm3, %v610_v63, -inf }
 0x435   : > { %621 = vmax.xlane.f32.xlu0 %v620_v0 }
 0x442   : > { %655 = vrot.lane.b32.xlu1 %v288_v35, %s2939_s22 }
 0x44f   : > { %v613_v1 = vpop.xlane.xlu1 %612 }
 0x450   : > { %v623_v3 = vsub.f32 %v607_v48, %v613_v1  ;;  %v3250_v1 = vld [vmem:[#allocation7 + $0x8] sm:$0xff] }
 0x452   : > { %v627_v4 = vmul.f32 1.442695, %v623_v3  ;;  %v1257_v3 = vsel %vm189_vm1, %v3250_v1, 0.0 }
 0x454   : > { %2758 = vpow2.f32 %v627_v4 }
 0x45e   : > { %v2759_v5 = vpop.eup %2758 }
 0x45f   : > { %v635_v6 = vsel %vm300_vm3, %v2759_v5, 0.0 }
 0x466   : > { %636 = vadd.xlane.f32.xlu1 %v635_v6 }
 0x4ba   : > { %v616_v7 = vpop.xlane.xlu0 %615 }
 0x4bb   : > { %v624_v8 = vsub.f32 %v608_v53, %v616_v7 }
 0x4bd   : > { %v629_v18 = vmul.f32 1.442695, %v624_v8 }
 0x4be   : > { %v619_v19 = vpop.xlane.xlu1 %618 }
 0x4bf   : > { %2760 = vpow2.f32 %v629_v18  ;;  %v625_v20 = vsub.f32 %v609_v58, %v619_v19 }
 0x4c1   : > { %v631_v21 = vmul.f32 1.442695, %v625_v20  ;;  %v978_v20 = vsub.s32 4, %v3134_v22 }
 0x4c2   : > { %v656_v23 = vpop.permute.xlu1 %655  ;;  %v622_v25 = vpop.xlane.xlu0 %621 }
 0x4c3   : > { %2762 = vpow2.f32 %v631_v21  ;;  %v626_v27 = vsub.f32 %v610_v63, %v622_v25  ;;  %2487 = vmatpush3.msra.mxu0 %v656_v23  ;;  %v3262_v23 = vrot.slane %v3138_v24, %v978_v20 }
 0x4c4   : > { %2496 = vmatprep.subr.mxu0 %v2934_v16 }
 0x4c5   : > { %v633_v28 = vmul.f32 1.442695, %v626_v27 }
 0x4c7   : > { %2764 = vpow2.f32 %v633_v28 }
 0x4c9   : > { %v2761_v30 = vpop.eup %2760 }
 0x4ca   : > { %v638_v31 = vsel %vm300_vm3, %v2761_v30, 0.0 }
 0x4cb   : > { %639 = vadd.xlane.f32.xlu0 %v638_v31 }
 0x4cd   : > { %v2763_v32 = vpop.eup %2762 }
 0x4ce   : > { %v641_v34 = vsel %vm300_vm3, %v2763_v32, 0.0 }
 0x4cf   : > { %642 = vadd.xlane.f32.xlu1 %v641_v34 }
 0x4d1   : > { %v2765_v35 = vpop.eup %2764 }
 0x4d2   : > { %v644_v36 = vsel %vm300_vm3, %v2765_v35, 0.0 }
 0x4d3   : > { %645 = vadd.xlane.f32.xlu0 %v644_v36 }
 0x4e0   : > { %807 = vrot.lane.b32.xlu1 %v3165_v38, %s2939_s22 }
 0x4e4   : > { %883 = vrot.lane.b32.xlu1 %v3169_v39, %s2939_s22 }
 0x4e8   : > { %2752 = vrot.lane.b32.xlu1 %v2751_v50, %s2940_s17  ;;  %v1085_v50 = vsub.s32 2, %v3134_v22 }
 0x4e9   : > { %731 = vrot.lane.b32.xlu0 %v3161_v37, %s2939_s22 }
 0x4ed   : > { %2747 = vrot.lane.b32.xlu0 %v2746_v13, %s2940_s17 }
 0x4f3   : > { %v637_v40 = vpop.xlane.xlu1 %636 }
 0x4f4   : > { %2766 = vrcp.f32 %v637_v40 }
 0x4fe   : > { %v2767_v41 = vpop.eup %2766 }
 0x4ff   : > { %v648_v42 = vmul.f32 %v2767_v41, %v2759_v5 }
 0x501   : > { %2489 = vmatmul.mubr.msk.f32.vlgmr.msra.gmra.mrb[2].mxu0 %vm300_vm3, %v648_v42 }
 0x502   : > { %2498 = vmatprep.mubr.msk.f32.mxu0 %vm2933_vm2, %v2934_v16 }
 0x558   : > { %v640_v38 = vpop.xlane.xlu0 %639 }
 0x559   : > { %2768 = vrcp.f32 %v640_v38 }
 0x55c   : > { %v643_v39 = vpop.xlane.xlu1 %642 }
 0x55d   : > { %2770 = vrcp.f32 %v643_v39  ;;  %v179_v39 = vld [vmem:[%s3088_s18 + $0x28] sm:$0xff] }
 0x560   : > { %v808_v43 = vpop.permute.xlu1 %807  ;;  %v646_v37 = vpop.xlane.xlu0 %645 }
 0x561   : > { %2772 = vrcp.f32 %v646_v37  ;;  %2497 = vmatpush3.msra.mxu0 %v808_v43  ;;  %v180_v37 = vld [vmem:[%s3088_s18 + $0x30] sm:$0xff] }
 0x562   : > { %2629 = vmatprep.subr.bf16.mxu0 %v2932_v12 }
 0x563   : > { %v2769_v44 = vpop.eup %2768 }
 0x564   : > { %v650_v46 = vmul.f32 %v2769_v44, %v2761_v30  ;;  %v732_v47 = vpop.permute.xlu0 %731  ;;  %v884_v48 = vpop.permute.xlu1 %883  ;;  %v181_v44 = vld [vmem:[%s3088_s18 + $0x38] sm:$0xff] }
 0x565   : > { %2492 = vmatpush3.msra.mxu1 %v732_v47 }
 0x566   : > { %2494 = vmatmul.mubr.msk.f32.vlgmr.msra.gmra.mrb[8].mxu1 %vm300_vm3, %v650_v46  ;;  %2501 = vmatprep.subr.mxu1 %v2934_v16  ;;  %v3282_v46 = vpack.c.bf16 %v181_v44, %v180_v37 }
 0x567   : > { %v2771_v9 = vpop.eup %2770  ;;  %2502 = vmatpush3.msra.mxu1 %v884_v48  ;;  %2503 = vmatprep.mubr.msk.f32.mxu1 %vm2933_vm2, %v2934_v16 }
 0x568   : > { %v652_v10 = vmul.f32 %v2771_v9, %v2763_v32  ;;  %2635 = vmatprep.subr.bf16.mxu1 %v2932_v12  ;;  %v2748_v51 = vpop.permute.xlu0 %2747  ;;  %v2753_v57 = vpop.permute.xlu1 %2752 }
 0x569   : > { %v2750_v52 = vunpack.i.h.bf16 %v2748_v51  ;;  %v2749_v53 = vunpack.i.l.bf16 %v2748_v51  ;;  %v2755_v58 = vunpack.i.h.bf16 %v2753_v57  ;;  %v2754_v59 = vunpack.i.l.bf16 %v2753_v57 }
 0x56a   : > { %2499 = vmatmul.mubr.msk.f32.vlgmr.msra.gmra.mrb[4].mxu0 %vm300_vm3, %v652_v10  ;;  %v1090_v51 = vsub.s32 3, %v3134_v22 }
 0x56b   : > { %v2773_v13 = vpop.eup %2772  ;;  %2514 = vmatprep.mubr.msk.f32.mxu0 %vm2933_vm2, %v2934_v16  ;;  %v3239_v54 = vpack.c.bf16 %v2750_v52, %v2749_v53  ;;  %v3243_v60 = vpack.c.bf16 %v2755_v58, %v2754_v59  ;;  %v3289_v52 = vrot.slane %v3138_v24, %v1085_v50 }
 0x56c   : > { %v654_v49 = vmul.f32 %v2773_v13, %v2765_v35 }
 0x56d   : > { %2631 = vmatpush3.bf16.msra.mxu0 %v3239_v54 }
 0x56e   : > { %2504 = vmatmul.mubr.msk.f32.vlgmr.msra.gmra.mrb[10].mxu1 %vm300_vm3, %v654_v49  ;;  %2632 = vmatprep.subr.bf16.mxu0 %v2932_v12 }
 0x56f   : > { %2525 = vmatprep.mubr.msk.f32.mxu1 %vm2933_vm2, %v2934_v16 }
 0x571   : > { %2634 = vmatpush3.bf16.msra.mxu0 %v3243_v60 }
 0x572   : > { %2641 = vmatprep.subr.bf16.mxu0 %v2932_v12 }
 0x5d4   : > { %v727_v55 = vpop.f32.mrb[2].mxu0 }
 0x5d5   : > { %v2490_v56 = vpop.f32.mrb[3].mxu0 }
 0x5d6   : > { %v3292_v56 = vrot.slane %v3138_v24, %v1090_v51 }
 0x639   : > { %v803_v11 = vpop.f32.mrb[8].mxu1 }
 0x63a   : > { %960 = vrot.lane.b32.xlu0 %v803_v11, %s2941_s20  ;;  %v2495_v15 = vpop.f32.mrb[9].mxu1 }
 0x63d   : > { %v879_v61 = vpop.f32.mrb[4].mxu0 }
 0x63e   : > { %964 = vrot.lane.b32.xlu1 %v879_v61, %s2942_s21  ;;  %v2500_v62 = vpop.f32.mrb[5].mxu0 }
 0x63f   : > { %v182_v62 = vld [vmem:[%s3088_s18 + $0x40] sm:$0xff] }
 0x641   : > { %v955_v63 = vpop.f32.mrb[10].mxu1 }
 0x642   : > { %968 = vrot.lane.b32.xlu0 %v955_v63, %s2943_s12  ;;  %v2505_v0 = vpop.f32.mrb[11].mxu1 }
 0x643   : > { %v185_v0 = vld [vmem:[%s3088_s18 + $0x58] sm:$0xff] }
 0x661   : > { %1258 = vadd.xlane.f32.xlu0 %v1257_v3 }
 0x6ac   : > { %v961_v4 = vpop.permute.xlu0 %960 }
 0x6ad   : > { %v971_v6 = vsel %vm300_vm3, %v727_v55, %v961_v4 }
 0x6b0   : > { %v965_v5 = vpop.permute.xlu1 %964 }
 0x6b1   : > { %v973_v7 = vsel %vm972_vm4, %v971_v6, %v965_v5 }
 0x6b4   : > { %v969_v8 = vpop.permute.xlu0 %968 }
 0x6b5   : > { %v975_v18 = vsel %vm974_vm5, %v973_v7, %v969_v8 }
 0x6b6   : > { %2515 = vmatmul.mubr.msk.f32.vlgmr.msra.gmra.mrb[6].mxu0 %vm189_vm1, %v975_v18 }
 0x6b7   : > { %2536 = vmatprep.mubr.msk.f32.mxu0 %vm2933_vm2, %v2934_v16 }
 0x6ee   : > { %v1259_v19 = vpop.xlane.xlu0 %1258 }
 0x6ef   : > { %v1260_v21 = vmul.f32 0.03125, %v1259_v19 }
 0x6f1   : > { %v1261_v25 = vsub.f32 %v3250_v1, %v1260_v21 }
 0x6f3   : > { %v1262_v32 = vmul.f32 %v1261_v25, %v1261_v25 }
 0x6f5   : > { %v1263_v35 = vsel %vm189_vm1, %v1262_v32, 0.0 }
 0x789   : > { %v1065_v27 = vpop.f32.mrb[6].mxu0 }
 0x78a   : > { %v1066_v28 = vadd.f32 %v1065_v27, %v3262_v23  ;;  %v2516_v30 = vpop.f32.mrb[7].mxu0 }
 0x78c   : > { %v3267_v31 = vadd.f32 %v1066_v28, %v3096_v2  ;;  %v178_v2 = vld [vmem:[%s3088_s18 + $0x20] sm:$0xff] }
 0x78d   : > { %v3276_v43 = vpack.c.bf16 %v179_v39, %v178_v2 }
 0x78e   : > { %v1070_v34 = vsel %vm189_vm1, %v3267_v31, 0.0 }
 0x78f   : > { %1071 = vadd.xlane.f32.xlu1 %v1070_v34  ;;  %2637 = vmatpush3.bf16.msra.mxu1 %v3276_v43 }
 0x790   : > { %2638 = vmatprep.subr.bf16.mxu1 %v2932_v12 }
 0x793   : > { %1264 = vadd.xlane.f32.xlu1 %v1263_v35  ;;  %2640 = vmatpush3.bf16.msra.mxu1 %v3282_v46 }
 0x794   : > { %2647 = vmatprep.subr.bf16.mxu1 %v2932_v12 }
 0x81c   : > { %v1072_v36 = vpop.xlane.xlu1 %1071 }
 0x81d   : > { %v1073_v40 = vmul.f32 0.03125, %v1072_v36 }
 0x81f   : > { %v1074_v41 = vsub.f32 %v3267_v31, %v1073_v40 }
 0x820   : > { %v1265_v47 = vpop.xlane.xlu1 %1264 }
 0x821   : > { %v1075_v42 = vmul.f32 %v1074_v41, %v1074_v41  ;;  %v1266_v48 = vmul.f32 0.03125, %v1265_v47 }
 0x823   : > { %v1076_v38 = vsel %vm189_vm1, %v1075_v42, 0.0  ;;  %v1267_v13 = vadd.f32 1e-05, %v1266_v48 }
 0x824   : > { %1077 = vadd.xlane.f32.xlu0 %v1076_v38 }
 0x8b1   : > { %v1078_v9 = vpop.xlane.xlu0 %1077 }
 0x8b2   : > { %v1079_v10 = vmul.f32 0.03125, %v1078_v9 }
 0x8b4   : > { %v1080_v49 = vadd.f32 1e-05, %v1079_v10 }
 0x8b6   : > { %2774 = vrsqrt.f32 %v1080_v49 }
 0x8b7   : > { %2776 = vrsqrt.f32 %v1267_v13 }
 0x8c0   : > { %v2775_v53 = vpop.eup %2774 }
 0x8c1   : > { %v1082_v55 = vmul.f32 %v2775_v53, %v1074_v41  ;;  %v2777_v57 = vpop.eup %2776  ;;  %v1181_v41 = vsub.s32 5, %v3134_v22 }
 0x8c2   : > { %v1269_v59 = vmul.f32 %v2777_v57, %v1261_v25 }
 0x8c3   : > { %v1087_v58 = vmul.f32 %v3289_v52, %v1082_v55  ;;  %v3358_v42 = vrot.slane %v3138_v24, %v1181_v41 }
 0x8c4   : > { %v1270_v15 = vmul.f32 %v1269_v59, %v3142_v26  ;;  %v184_v26 = vld [vmem:[%s3088_s18 + $0x50] sm:$0xff] }
 0x8c5   : > { %v1092_v11 = vadd.f32 %v3292_v56, %v1087_v58 }
 0x8c6   : > { %v1271_v61 = vadd.f32 %v1270_v15, %v3145_v29  ;;  %v1095_v29 = vsub.s32 6, %v3134_v22 }
 0x8c7   : > { %2526 = vmatmul.mubr.msk.f32.vlgmr.msra.gmra.mrb[12].mxu1 %vm189_vm1, %v1092_v11 }
 0x8c8   : > { %2649 = vmatpush3.bf16.msra.mxu1 %v3116_v14  ;;  %2547 = vmatprep.mubr.msk.f32.mxu1 %vm2933_vm2, %v2934_v16  ;;  %v183_v14 = vld [vmem:[%s3088_s18 + $0x48] sm:$0xff]  ;;  %v3322_v3 = vrot.slane %v3138_v24, %v1095_v29 }
 0x8c9   : > { %2650 = vmatprep.subr.bf16.mxu1 %v2932_v12  ;;  %v3310_v63 = vpack.c.bf16 %v183_v14, %v182_v62 }
 0x8cb   : > { %2643 = vmatpush3.bf16.xpose.msra.mxu0 %v3310_v63 }
 0x8cc   : > { %2652 = vmatpush3.bf16.msra.mxu1 %v3129_v17  ;;  %2644 = vmatprep.subr.bf16.mxu0 %v2932_v12  ;;  %v3316_v17 = vpack.c.bf16 %v185_v0, %v184_v26 }
 0x8cd   : > { %2550 = vmatprep.subr.mxu1 %v2934_v16 }
 0x8cf   : > { %2548 = vmatmul.mubr.msk.f32.vlgmr.msra.gmra.mrb[14].mxu1 %vm189_vm1, %v1271_v61 }
 0x8d0   : > { %2552 = vmatprep.mubr.msk.f32.mxu1 %vm2933_vm2, %v2934_v16 }
 0x8d3   : > { %2646 = vmatpush3.bf16.xpose.msra.mxu0 %v3316_v17 }
 0x8d4   : > { %2560 = vmatprep.subr.mxu0 %v2934_v16 }
 0x99a   : > { %v1166_v4 = vpop.f32.mrb[12].mxu1 }
 0x99b   : > { %v1167_v5 = vadd.f32 %v1166_v4, %v3322_v3  ;;  %v2527_v6 = vpop.f32.mrb[13].mxu1 }
 0x99d   : > { %v1171_v7 = vmul.f32 0.044715, %v1167_v5  ;;  %v1170_v30 = vmul.f32 0.5, %v1167_v5 }
 0x99f   : > { %v1172_v8 = vmul.f32 %v1171_v7, %v1167_v5 }
 0x9a1   : > { %v1173_v18 = vmul.f32 %v1172_v8, %v1167_v5 }
 0x9a2   : > { %v1341_v19 = vpop.f32.mrb[14].mxu1 }
 0x9a3   : > { %v1174_v20 = vadd.f32 %v1173_v18, %v1167_v5  ;;  %v3326_v21 = vadd.f32 %v1341_v19, %v3154_v33  ;;  %v2549_v25 = vpop.f32.mrb[15].mxu1 }
 0x9a5   : > { %1348 = vrot.lane.b32.xlu1 %v3326_v21, %s2937_s30  ;;  %1346 = vrot.lane.b32.xlu0 %v3326_v21, %s2936_s15  ;;  %v1175_v27 = vmul.f32 0.7978846, %v1174_v20 }
 0x9a7   : > { %2778 = vtanh.f32 %v1175_v27 }
 0x9a9   : > { %1350 = vrot.lane.b32.xlu1 %v3326_v21, %s2935_s14  ;;  %1352 = vrot.lane.b32.xlu0 %v3326_v21, %s2938_s3 }
 0x9b1   : > { %v2779_v28 = vpop.eup %2778 }
 0x9b2   : > { %v1177_v32 = vadd.f32 1.0, %v2779_v28 }
 0x9b4   : > { %v1178_v33 = vmul.f32 %v1177_v32, %v1170_v30 }
 0x9b6   : > { %2537 = vmatmul.mubr.f32.vlgmr.msra.gmra.mrb[8].mxu0 %v1178_v33 }
 0x9b7   : > { %2562 = vmatprep.mubr.msk.f32.mxu0 %vm2933_vm2, %v2934_v16 }
 0xa17   : > { %v3338_v34 = vpop.permute.xlu1 %1348  ;;  %v3340_v35 = vpop.permute.xlu0 %1346 }
 0xa18   : > { %1504 = vrot.lane.b32.xlu0 %v3338_v34, %s2938_s3  ;;  %1428 = vrot.lane.b32.xlu1 %v3340_v35, %s2938_s3 }
 0xa1b   : > { %v3346_v36 = vpop.permute.xlu1 %1350  ;;  %v1353_v40 = vpop.permute.xlu0 %1352 }
 0xa1c   : > { %1580 = vrot.lane.b32.xlu1 %v3346_v36, %s2938_s3  ;;  %2551 = vmatpush3.xpose.msk.msra.mxu1 %vm300_vm3, %v1353_v40 }
 0xa1d   : > { %2555 = vmatprep.subr.mxu1 %v2934_v16 }
 0xa1f   : > { %2553 = vmatmul.mubr.msk.f32.vlgmr.msra.gmra.mrb[16].mxu1 %vm300_vm3, %v3326_v21 }
 0xa20   : > { %2557 = vmatprep.mubr.msk.f32.mxu1 %vm2933_vm2, %v2934_v16 }
 0xa89   : > { %v1249_v38 = vpop.f32.mrb[8].mxu0 }
 0xa8a   : > { %v1250_v2 = vadd.f32 %v1249_v38, %v3358_v42  ;;  %v1429_v39 = vpop.permute.xlu1 %1428  ;;  %v1505_v37 = vpop.permute.xlu0 %1504 }
 0xa8b   : > { %v2538_v44 = vpop.f32.mrb[9].mxu0  ;;  %2556 = vmatpush3.xpose.msk.msra.mxu1 %vm300_vm3, %v1429_v39  ;;  %2561 = vmatpush3.xpose.msk.msra.mxu0 %vm300_vm3, %v1505_v37 }
 0xa8c   : > { %v1253_v47 = vadd.f32 %v1250_v2, %v3267_v31  ;;  %2565 = vmatprep.subr.mxu1 %v2934_v16  ;;  %2570 = vmatprep.subr.mxu0 %v2934_v16 }
 0xa8e   : > { %1254 = vst.msk [vmem:[#allocation7] sm:$0xff] %vm189_vm1, %v1253_v47  ;;  %v1581_v22 = vpop.permute.xlu1 %1580  ;;  %2558 = vmatmul.mubr.msk.f32.vlgmr.msra.gmra.mrb[18].mxu1 %vm300_vm3, %v3340_v35  ;;  %2563 = vmatmul.mubr.msk.f32.vlgmr.msra.gmra.mrb[10].mxu0 %vm300_vm3, %v3338_v34 }
 0xa8f   : > { %2566 = vmatpush3.xpose.msk.msra.mxu1 %vm300_vm3, %v1581_v22  ;;  %2567 = vmatprep.mubr.msk.f32.mxu1 %vm2933_vm2, %v2934_v16 }
 0xa90   : > { %2572 = vmatprep.mubr.msk.f32.mxu0 %vm2933_vm2, %v2934_v16  ;;  %2575 = vmatprep.subr.mxu1 %v2934_v16 }
 0xa92   : > { %2568 = vmatmul.mubr.msk.f32.vlgmr.msra.gmra.mrb[20].mxu1 %vm300_vm3, %v3346_v36 }
 0xa93   : > { %2577 = vmatprep.mubr.msk.f32.mxu1 %vm2933_vm2, %v2934_v16 }
 0xaf2   : > { %v1424_v24 = vpop.f32.mrb[16].mxu1 }
 0xaf3   : > { %v1656_v31 = vmul.f32 0.35355338, %v1424_v24  ;;  %v2554_v48 = vpop.f32.mrb[17].mxu1 }
 0xaf5   : > { %v1660_v9 = vadd.f32 %v1656_v31, %v3197_v45 }
 0xaf7   : > { %v1664_v10 = vsel %vm300_vm3, %v1660_v9, -inf }
 0xaf8   : > { %1665 = vmax.xlane.f32.xlu0 %v1664_v10 }
 0xb61   : > { %v1500_v13 = vpop.f32.mrb[18].mxu1  ;;  %v1576_v49 = vpop.f32.mrb[10].mxu0 }
 0xb62   : > { %v1657_v50 = vmul.f32 0.35355338, %v1500_v13  ;;  %v1658_v51 = vmul.f32 0.35355338, %v1576_v49  ;;  %v2559_v53 = vpop.f32.mrb[19].mxu1  ;;  %v2564_v55 = vpop.f32.mrb[11].mxu0 }
 0xb64   : > { %v1662_v57 = vadd.f32 %v1658_v51, %v3197_v45  ;;  %v1661_v58 = vadd.f32 %v1657_v50, %v3197_v45 }
 0xb65   : > { %v1652_v59 = vpop.f32.mrb[20].mxu1 }
 0xb66   : > { %v1659_v11 = vmul.f32 0.35355338, %v1652_v59  ;;  %v2569_v15 = vpop.f32.mrb[21].mxu1  ;;  %v1670_v61 = vsel %vm300_vm3, %v1662_v57, -inf  ;;  %v1667_v62 = vsel %vm300_vm3, %v1661_v58, -inf }
 0xb67   : > { %1671 = vmax.xlane.f32.xlu0 %v1670_v61  ;;  %1668 = vmax.xlane.f32.xlu1 %v1667_v62 }
 0xb68   : > { %v1663_v14 = vadd.f32 %v1659_v11, %v3197_v45 }
 0xb6a   : > { %v1673_v26 = vsel %vm300_vm3, %v1663_v14, -inf }
 0xb6b   : > { %1674 = vmax.xlane.f32.xlu0 %v1673_v26 }
 0xb78   : > { %1708 = vrot.lane.b32.xlu1 %v3326_v21, %s2939_s22 }
 0xb85   : > { %v1666_v0 = vpop.xlane.xlu0 %1665 }
 0xb86   : > { %v1676_v29 = vsub.f32 %v1660_v9, %v1666_v0 }
 0xb88   : > { %v1680_v4 = vmul.f32 1.442695, %v1676_v29 }
 0xb8a   : > { %2780 = vpow2.f32 %v1680_v4 }
 0xb94   : > { %v2781_v5 = vpop.eup %2780 }
 0xb95   : > { %v1688_v6 = vsel %vm300_vm3, %v2781_v5, 0.0 }
 0xb9c   : > { %1689 = vadd.xlane.f32.xlu1 %v1688_v6 }
 0xbf4   : > { %v1672_v7 = vpop.xlane.xlu0 %1671  ;;  %v1669_v8 = vpop.xlane.xlu1 %1668 }
 0xbf5   : > { %v1678_v18 = vsub.f32 %v1662_v57, %v1672_v7  ;;  %v1677_v19 = vsub.f32 %v1661_v58, %v1669_v8 }
 0xbf7   : > { %v1684_v20 = vmul.f32 1.442695, %v1678_v18  ;;  %v1682_v45 = vmul.f32 1.442695, %v1677_v19 }
 0xbf8   : > { %v1709_v25 = vpop.permute.xlu1 %1708  ;;  %v1675_v27 = vpop.xlane.xlu0 %1674 }
 0xbf9   : > { %2782 = vpow2.f32 %v1684_v20  ;;  %v1679_v28 = vsub.f32 %v1663_v14, %v1675_v27  ;;  %2571 = vmatpush3.msra.mxu0 %v1709_v25 }
 0xbfa   : > { %2784 = vpow2.f32 %v1682_v45  ;;  %2580 = vmatprep.subr.mxu0 %v2934_v16 }
 0xbfb   : > { %v1686_v21 = vmul.f32 1.442695, %v1679_v28 }
 0xbfd   : > { %2786 = vpow2.f32 %v1686_v21 }
 0xc03   : > { %v2783_v30 = vpop.eup %2782 }
 0xc04   : > { %v2785_v32 = vpop.eup %2784  ;;  %v1694_v33 = vsel %vm300_vm3, %v2783_v30, 0.0 }
 0xc05   : > { %1695 = vadd.xlane.f32.xlu1 %v1694_v33  ;;  %v1691_v40 = vsel %vm300_vm3, %v2785_v32, 0.0 }
 0xc06   : > { %1692 = vadd.xlane.f32.xlu0 %v1691_v40 }
 0xc07   : > { %v2787_v41 = vpop.eup %2786 }
 0xc08   : > { %v1697_v38 = vsel %vm300_vm3, %v2787_v41, 0.0 }
 0xc0a   : > { %1698 = vadd.xlane.f32.xlu0 %v1697_v38 }
 0xc16   : > { %1860 = vrot.lane.b32.xlu1 %v3338_v34, %s2939_s22 }
 0xc1a   : > { %1936 = vrot.lane.b32.xlu1 %v3346_v36, %s2939_s22 }
 0xc20   : > { %1784 = vrot.lane.b32.xlu0 %v3340_v35, %s2939_s22 }
 0xc29   : > { %v1690_v2 = vpop.xlane.xlu1 %1689 }
 0xc2a   : > { %2788 = vrcp.f32 %v1690_v2 }
 0xc34   : > { %v2789_v39 = vpop.eup %2788 }
 0xc35   : > { %v1701_v37 = vmul.f32 %v2789_v39, %v2781_v5 }
 0xc37   : > { %2573 = vmatmul.mubr.msk.f32.vlgmr.msra.gmra.mrb[12].mxu0 %vm300_vm3, %v1701_v37 }
 0xc38   : > { %2582 = vmatprep.mubr.msk.f32.mxu0 %vm2933_vm2, %v2934_v16 }
 0xc92   : > { %v1696_v44 = vpop.xlane.xlu1 %1695 }
 0xc93   : > { %2790 = vrcp.f32 %v1696_v44  ;;  %v1693_v47 = vpop.xlane.xlu0 %1692 }
 0xc94   : > { %2792 = vrcp.f32 %v1693_v47 }
 0xc96   : > { %v1861_v34 = vpop.permute.xlu1 %1860 }
 0xc97   : > { %v1699_v22 = vpop.xlane.xlu0 %1698  ;;  %2581 = vmatpush3.msra.mxu0 %v1861_v34 }
 0xc98   : > { %2794 = vrcp.f32 %v1699_v22  ;;  %2653 = vmatprep.subr.bf16.mxu0 %v2932_v12 }
 0xc9a   : > { %v1937_v9 = vpop.permute.xlu1 %1936 }
 0xc9b   : > { %v1785_v35 = vpop.permute.xlu0 %1784 }
 0xc9c   : > { %2576 = vmatpush3.msra.mxu1 %v1785_v35 }
 0xc9d   : > { %v2791_v36 = vpop.eup %2790  ;;  %2585 = vmatprep.subr.mxu1 %v2934_v16 }
 0xc9e   : > { %v2793_v24 = vpop.eup %2792  ;;  %v1705_v31 = vmul.f32 %v2791_v36, %v2783_v30 }
 0xc9f   : > { %v1703_v48 = vmul.f32 %v2793_v24, %v2785_v32 }
 0xca0   : > { %2583 = vmatmul.mubr.msk.f32.vlgmr.msra.gmra.mrb[14].mxu0 %vm300_vm3, %v1705_v31 }
 0xca1   : > { %2578 = vmatmul.mubr.msk.f32.vlgmr.msra.gmra.mrb[22].mxu1 %vm300_vm3, %v1703_v48  ;;  %2655 = vmatpush3.bf16.msra.mxu0 %v3239_v54 }
 0xca2   : > { %v2795_v10 = vpop.eup %2794  ;;  %2586 = vmatpush3.msra.mxu1 %v1937_v9  ;;  %2587 = vmatprep.mubr.msk.f32.mxu1 %vm2933_vm2, %v2934_v16 }
 0xca3   : > { %v1707_v13 = vmul.f32 %v2795_v10, %v2787_v41  ;;  %2656 = vmatprep.subr.bf16.mxu0 %v2932_v12  ;;  %2598 = vmatprep.mubr.msk.f32.mxu0 %vm2933_vm2, %v2934_v16 }
 0xca4   : > { %2659 = vmatprep.subr.bf16.mxu1 %v2932_v12 }
 0xca5   : > { %2588 = vmatmul.mubr.msk.f32.vlgmr.msra.gmra.mrb[24].mxu1 %vm300_vm3, %v1707_v13  ;;  %2658 = vmatpush3.bf16.msra.mxu0 %v3243_v60 }
 0xca6   : > { %2661 = vmatpush3.bf16.msra.mxu1 %v3276_v43  ;;  %2609 = vmatprep.mubr.msk.f32.mxu1 %vm2933_vm2, %v2934_v16 }
 0xca7   : > { %2662 = vmatprep.subr.bf16.mxu1 %v2932_v12  ;;  %2665 = vmatprep.subr.bf16.mxu0 %v2932_v12 }
 0xcaa   : > { %2664 = vmatpush3.bf16.msra.mxu1 %v3282_v46 }
 0xd0a   : > { %v1780_v54 = vpop.f32.mrb[12].mxu0 }
 0xd0b   : > { %v2574_v49 = vpop.f32.mrb[13].mxu0 }
 0xd73   : > { %v1932_v50 = vpop.f32.mrb[14].mxu0 }
 0xd74   : > { %v1856_v51 = vpop.f32.mrb[22].mxu1  ;;  %2017 = vrot.lane.b32.xlu1 %v1932_v50, %s2942_s21  ;;  %v2584_v53 = vpop.f32.mrb[15].mxu0 }
 0xd75   : > { %2013 = vrot.lane.b32.xlu0 %v1856_v51, %s2941_s20  ;;  %v2579_v60 = vpop.f32.mrb[23].mxu1 }
 0xd78   : > { %v2008_v43 = vpop.f32.mrb[24].mxu1 }
 0xd79   : > { %2021 = vrot.lane.b32.xlu0 %v2008_v43, %s2943_s12  ;;  %v2589_v55 = vpop.f32.mrb[25].mxu1 }
 0xde6   : > { %v2018_v58 = vpop.permute.xlu1 %2017 }
 0xde7   : > { %v2014_v57 = vpop.permute.xlu0 %2013 }
 0xde8   : > { %v2024_v59 = vsel %vm300_vm3, %v1780_v54, %v2014_v57 }
 0xde9   : > { %v2025_v46 = vsel %vm972_vm4, %v2024_v59, %v2018_v58 }
 0xdeb   : > { %v2022_v11 = vpop.permute.xlu0 %2021 }
 0xdec   : > { %v2026_v15 = vsel %vm974_vm5, %v2025_v46, %v2022_v11 }
 0xded   : > { %2599 = vmatmul.mubr.msk.f32.vlgmr.msra.gmra.mrb[16].mxu0 %vm189_vm1, %v2026_v15 }
 0xdee   : > { %2667 = vmatpush3.bf16.xpose.msra.mxu0 %v3310_v63  ;;  %2620 = vmatprep.mubr.msk.f32.mxu0 %vm2933_vm2, %v2934_v16 }
 0xdef   : > { %2668 = vmatprep.subr.bf16.mxu0 %v2932_v12 }
 0xdf6   : > { %2670 = vmatpush3.bf16.xpose.msra.mxu0 %v3316_v17 }
 0xec0   : > { %v2096_v61 = vpop.f32.mrb[16].mxu0 }
 0xec1   : > { %v2097_v62 = vadd.f32 %v2096_v61, %v3262_v23  ;;  %v2600_v14 = vpop.f32.mrb[17].mxu0 }
 0xec3   : > { %v2100_v26 = vadd.f32 %v2097_v62, %v3250_v1 }
 0xec5   : > { %v2101_v0 = vsel %vm189_vm1, %v2100_v26, 0.0 }
 0xec6   : > { %2102 = vadd.xlane.f32.xlu1 %v2101_v0 }
 0xf53   : > { %v2103_v29 = vpop.xlane.xlu1 %2102 }
 0xf54   : > { %v2104_v4 = vmul.f32 0.03125, %v2103_v29 }
 0xf56   : > { %v2105_v5 = vsub.f32 %v2100_v26, %v2104_v4 }
 0xf58   : > { %v2106_v63 = vmul.f32 %v2105_v5, %v2105_v5 }
 0xf5a   : > { %v2107_v6 = vsel %vm189_vm1, %v2106_v63, 0.0 }
 0xf5b   : > { %2108 = vadd.xlane.f32.xlu0 %v2107_v6 }
 0xfe8   : > { %v2109_v16 = vpop.xlane.xlu0 %2108 }
 0xfe9   : > { %v2110_v12 = vmul.f32 0.03125, %v2109_v16 }
 0xfeb   : > { %v2111_v7 = vadd.f32 1e-05, %v2110_v12 }
 0xfed   : > { %2796 = vrsqrt.f32 %v2111_v7 }
 0xff7   : > { %v2797_v17 = vpop.eup %2796 }
 0xff8   : > { %v2113_v8 = vmul.f32 %v2797_v17, %v2105_v5 }
 0xffa   : > { %v2114_v23 = vmul.f32 %v2113_v8, %v3289_v52 }
 0xffc   : > { %v2115_v1 = vadd.f32 %v2114_v23, %v3292_v56 }
 0xffe   : > { %2610 = vmatmul.mubr.msk.f32.vlgmr.msra.gmra.mrb[26].mxu1 %vm189_vm1, %v2115_v1 }
0x10d1   : > { %v2185_v18 = vpop.f32.mrb[26].mxu1 }
0x10d2   : > { %v2186_v19 = vadd.f32 %v2185_v18, %v3322_v3  ;;  %v2611_v20 = vpop.f32.mrb[27].mxu1 }
0x10d4   : > { %v2190_v45 = vmul.f32 0.044715, %v2186_v19  ;;  %v2189_v32 = vmul.f32 0.5, %v2186_v19 }
0x10d6   : > { %v2191_v25 = vmul.f32 %v2190_v45, %v2186_v19 }
0x10d8   : > { %v2192_v27 = vmul.f32 %v2191_v25, %v2186_v19 }
0x10da   : > { %v2193_v28 = vadd.f32 %v2192_v27, %v2186_v19 }
0x10dc   : > { %v2194_v21 = vmul.f32 0.7978846, %v2193_v28 }
0x10de   : > { %2798 = vtanh.f32 %v2194_v21 }
0x10e8   : > { %v2799_v30 = vpop.eup %2798 }
0x10e9   : > { %v2196_v33 = vadd.f32 1.0, %v2799_v30 }
0x10eb   : > { %v2197_v52 = vmul.f32 %v2196_v33, %v2189_v32 }
0x10ed   : > { %2621 = vmatmul.mubr.f32.vlgmr.msra.gmra.mrb[18].mxu0 %v2197_v52 }
0x11c0   : > { %v2264_v56 = vpop.f32.mrb[18].mxu0 }
0x11c1   : > { %v2265_v40 = vadd.f32 %v2264_v56, %v3358_v42  ;;  %v2622_v3 = vpop.f32.mrb[19].mxu0 }
0x11c3   : > { %v2268_v41 = vadd.f32 %v2265_v40, %v2100_v26 }
0x11c5   : > { %2269 = vst.msk [vmem:[#allocation7 + $0x8] sm:$0xff] %vm189_vm1, %v2268_v41 }
0x11c6   : > { %2871 = shalt.err (!%p2868_p0)
}
0x11c7   : > { %s2872_s28 = scalar_lea.hbm %s3485_s2, 256 }
0x11c8   : > { %p2873_p2 = scmp.ne.s32.totalorder %s3485_s2, %s2872_s28  ;;  %p2878_p3 = scmp.lt.u32.totalorder %s2872_s28, %s3485_s2 }
0x11ca   : > { %p2874_p11 = pnand %p2873_p2, %p2695_p1 }
0x11cc   : > { %p2875_p13 = pneg %p2874_p11 }
0x11ce   : > { %p2880_p7 = pnand %p2878_p3, %p2875_p13 }
0x11d0   : > { %2883 = shalt.err (!%p2880_p7)
}
0x11d1   : > { %s2945_s8 = smov 128  }
0x11d2   : > { %2681 = dma.vmem_to_hbm [thread:$0]  (%p2695_p1), %s2277_s24, 256, %s3485_s2, [#allocation4], %s2945_s8, %s2945_s8, %s2941_s20  }
0x11d3   : > { %2909 = dma.done.wait (%p2695_p1), [#allocation4], 256  }
0x11d4   : > { %2911 = vsyncadd (%p2695_p1), [#allocation4], 4294967040 }
0x11d5 PF: > { %p14_p10 = scmp.ge.s32.totalorder %s3006_s19, 4   ;;  %s3498_s9 = smov %s2918_s10 }
0x11d6   : > { %s3499_s10 = smov %s2922_s11  ;;  %s3500_s11 = smov %s3035_s6 }
0x11d7   : > { %s3501_s12 = smov %s3006_s19  ;;  %16 = sbr.rel (!%p14_p10) target bundleno = 5 (0x5), region = 75 }
0x11de   :  { %2292 = vsyncpa [#allocation3], 1 }
0x11df   :  { %2294 = vsyncpa [#allocation3 + $0x1], 1 }
0x11e0   :  { %2295 = vsyncpa [#allocation6], 1 }
0x11e1   :  { %2297 = vsyncpa [#allocation6 + $0x1], 1 }
0x11e2   :  { %2298 = vsyncpa [#allocation4], 1 }
0x11e3   :  { %2300 = vsyncpa [#allocation4 + $0x1], 1 }

</bundles_post_ra>
